<compile_context>
chip_gen: v5e
topology: v5e:2x2
jax: 0.10.0
libtpu: 0.0.40
codegen_flags: <defaults>
</compile_context>

<pallas_src>
import functools
import math

import jax
import jax.numpy as jnp
from jax.experimental import pallas as pl
from jax.experimental.pallas import tpu as pltpu


def _largest_divisor_leq(n, cap):
    for c in range(min(n, cap), 0, -1):
        if n % c == 0:
            return c
    return 1


# ------------------------------------------------------------------ fused kernel
def _fused_transformer_kernel(nhead, bb, seq, kv_block,
                              x_ref,
                              wqkv_ref, bqkv_ref, wo_ref, bo_ref,
                              ln1w_ref, ln1b_ref,
                              w1_ref, b1_ref, w2_ref, b2_ref,
                              ln2w_ref, ln2b_ref,
                              wd_ref, bd_ref,
                              o_ref,
                              act_ref):
    l = pl.program_id(1)
    n_layers = pl.num_programs(1)

    S = seq
    M, D = act_ref.shape            # M = bb * S
    H = nhead
    hd = D // H
    n_kv = S // kv_block

    # Load the input activations for this batch block once (layer 0); afterwards the
    # activation stays resident in VMEM scratch across the layer axis.
    @pl.when(l == 0)
    def _():
        act_ref[...] = x_ref[0].astype(jnp.float32)

    # Per-layer weights: the full (L, ...) stacks are VMEM-resident (constant index_map);
    # dynamically index the current layer -- no per-step weight DMA.
    wqkv_l = wqkv_ref[l]            # (D, 3D) bf16, Q columns pre-scaled by 1/sqrt(hd)
    bqkv_l = bqkv_ref[l]            # (1, 3D) f32
    wo_l = wo_ref[l]                # (D, D)  bf16
    bo_l = bo_ref[l]                # (1, D)  f32
    ln1w = ln1w_ref[l]
    ln1b = ln1b_ref[l]
    w1_l = w1_ref[l]                # (D, F)  bf16
    b1_l = b1_ref[l]                # (1, F)  f32
    w2_l = w2_ref[l]                # (F, D)  bf16
    b2_l = b2_ref[l]                # (1, D)  f32
    ln2w = ln2w_ref[l]
    ln2b = ln2b_ref[l]

    x = act_ref[...]                # (M, D) f32
    x_bf = x.astype(jnp.bfloat16)

    # ---- fused QKV projection: one (M, D) @ (D, 3D) MXU matmul ----
    qkv = jnp.dot(x_bf, wqkv_l, preferred_element_type=jnp.float32) + bqkv_l
    q = qkv[:, :D]                  # scale already folded into weights
    k = qkv[:, D:2 * D]
    v = qkv[:, 2 * D:]

    # ---- flash-style attention (per batch element / per head, KV-tiled online softmax) ----
    attn_rows = []
    for b in range(bb):
        r0 = b * S
        q_b = q[r0:r0 + S]
        k_b = k[r0:r0 + S]
        v_b = v[r0:r0 + S]
        attn_b = None
        for h in range(H):
            c0 = h * hd
            qh = q_b[:, c0:c0 + hd].astype(jnp.bfloat16)            # (S, hd)

            def kv_slice(arr, kb, _c0=c0):
                return arr[kb * kv_block:(kb + 1) * kv_block,
                           _c0:_c0 + hd].astype(jnp.bfloat16)       # (tk, hd)

            # KV block 0 initializes the running statistics (no -inf needed).
            kh = kv_slice(k_b, 0)
            vh = kv_slice(v_b, 0)
            s = jax.lax.dot_general(qh, kh, (((1,), (1,)), ((), ())),
                                    preferred_element_type=jnp.float32)     # (S, tk)
            m = jnp.max(s, axis=-1, keepdims=True)
            p = jnp.exp(s - m)
            lsum = jnp.sum(p, axis=-1, keepdims=True)
            acc = jnp.dot(p.astype(jnp.bfloat16), vh,
                          preferred_element_type=jnp.float32)               # (S, hd)

            for kb in range(1, n_kv):
                kh = kv_slice(k_b, kb)
                vh = kv_slice(v_b, kb)
                s = jax.lax.dot_general(qh, kh, (((1,), (1,)), ((), ())),
                                        preferred_element_type=jnp.float32)
                m_new = jnp.maximum(m, jnp.max(s, axis=-1, keepdims=True))
                alpha = jnp.exp(m - m_new)
                p = jnp.exp(s - m_new)
                lsum = alpha * lsum + jnp.sum(p, axis=-1, keepdims=True)
                acc = alpha * acc + jnp.dot(p.astype(jnp.bfloat16), vh,
                                            preferred_element_type=jnp.float32)
                m = m_new

            # Deferred normalization: one (S, hd)-sized multiply, EUP reciprocal.
            ctx_h = acc * pl.reciprocal(lsum, approx=True)

            # Per-head output projection accumulation (no head concat / transpose).
            proj = jnp.dot(ctx_h.astype(jnp.bfloat16), wo_l[c0:c0 + hd, :],
                           preferred_element_type=jnp.float32)              # (S, D)
            attn_b = proj if attn_b is None else attn_b + proj
        attn_rows.append(attn_b)

    attn = jnp.concatenate(attn_rows, axis=0) + bo_l                        # (M, D)

    # ---- residual + LayerNorm1 (post-norm; dropout == identity in eval mode) ----
    y = x + attn
    mu = jnp.mean(y, axis=-1, keepdims=True)
    var = jnp.mean((y - mu) ** 2, axis=-1, keepdims=True)
    y = (y - mu) * jax.lax.rsqrt(var + 1e-5) * ln1w + ln1b

    # ---- feed-forward (ReLU = PyTorch default activation) ----
    h1 = jnp.maximum(
        jnp.dot(y.astype(jnp.bfloat16), w1_l, preferred_element_type=jnp.float32) + b1_l,
        0.0)
    ff = jnp.dot(h1.astype(jnp.bfloat16), w2_l, preferred_element_type=jnp.float32) + b2_l

    # ---- residual + LayerNorm2 ----
    z = y + ff
    mu2 = jnp.mean(z, axis=-1, keepdims=True)
    var2 = jnp.mean((z - mu2) ** 2, axis=-1, keepdims=True)
    z = (z - mu2) * jax.lax.rsqrt(var2 + 1e-5) * ln2w + ln2b

    act_ref[...] = z

    # ---- last layer: mean over sequence + dense classifier (lane-padded output) ----
    @pl.when(l == n_layers - 1)
    def _():
        pooled = jnp.concatenate(
            [jnp.mean(z[b * S:(b + 1) * S], axis=0, keepdims=True) for b in range(bb)],
            axis=0)                                                         # (bb, D)
        logits = jnp.dot(pooled.astype(jnp.bfloat16), wd_ref[...],
                         preferred_element_type=jnp.float32) + bd_ref[...]  # (bb, Cpad)
        o_ref[0] = logits.astype(o_ref.dtype)


# ------------------------------------------------------------------ wrapper
def transformer1d_forward(x, params, *, nhead, n_classes, batch_block=None):
    """x: (batch, n_channel=d_model, n_length) -- identical to the PyTorch module's input."""
    B, D, S = x.shape
    h = jnp.transpose(x, (0, 2, 1)).astype(jnp.float32)       # (B, seq, d_model)

    L = params['wqkv'].shape[0]
    Cpad = params['dense_w'].shape[1]

    # Batch blocking: amortize per-grid-step overhead, but keep >=2 parallel blocks when
    # possible so both v7x TensorCores get work.
    if batch_block is None:
        batch_block = next((c for c in (8, 4, 2) if B % c == 0 and B // c >= 2), 1)
    bb = batch_block
    assert B % bb == 0, "batch_block must divide batch"
    n_bblocks = B // bb

    # KV tile size for the flash-style attention loop (divides S, <= 512 -> fits v7x VMEM).
    kv_block = _largest_divisor_leq(S, 512)

    # Fold bb batch elements into one (bb*S, D) activation slab per grid step.
    h = h.reshape(n_bblocks, bb * S, D)

    def resident_spec(arr):
        nd = arr.ndim
        return pl.BlockSpec(arr.shape, lambda b, l, _nd=nd: (0,) * _nd)

    in_specs = [
        pl.BlockSpec((1, bb * S, D), lambda b, l: (b, 0, 0)),     # activation input
        resident_spec(params['wqkv']), resident_spec(params['bqkv']),
        resident_spec(params['wo']), resident_spec(params['bo']),
        resident_spec(params['ln1_w']), resident_spec(params['ln1_b']),
        resident_spec(params['w1']), resident_spec(params['b1']),
        resident_spec(params['w2']), resident_spec(params['b2']),
        resident_spec(params['ln2_w']), resident_spec(params['ln2_b']),
        resident_spec(params['dense_w']), resident_spec(params['dense_b']),
    ]

    out_padded = pl.pallas_call(
        functools.partial(_fused_transformer_kernel, nhead, bb, S, kv_block),
        out_shape=jax.ShapeDtypeStruct((n_bblocks, bb, Cpad), jnp.float32),
        grid_spec=pltpu.PrefetchScalarGridSpec(
            num_scalar_prefetch=0,
            grid=(n_bblocks, L),
            in_specs=in_specs,
            out_specs=pl.BlockSpec((1, bb, Cpad), lambda b, l: (b, 0, 0)),
            scratch_shapes=[pltpu.VMEM((bb * S, D), jnp.float32)],
        ),
        compiler_params=pltpu.CompilerParams(
            dimension_semantics=("parallel", "arbitrary"),
            vmem_limit_bytes=32 * 1024 * 1024,
        ),
    )(h,
      params['wqkv'], params['bqkv'], params['wo'], params['bo'],
      params['ln1_w'], params['ln1_b'],
      params['w1'], params['b1'], params['w2'], params['b2'],
      params['ln2_w'], params['ln2_b'],
      params['dense_w'], params['dense_b'])

    return out_padded.reshape(B, Cpad)[:, :n_classes]


# ------------------------------------------------------------------ parameters (deterministic)
def init_params(key, d_model, nhead, dim_ff, n_classes, n_layers=6):
    D, F = d_model, dim_ff
    hd = D // nhead
    attn_scale = 1.0 / math.sqrt(hd)

    wqkv, bqkv, wo, bo, w1, b1, w2, b2 = ([] for _ in range(8))
    for _ in range(n_layers):
        key, *ks = jax.random.split(key, 9)
        sc = 1.0 / jnp.sqrt(jnp.float32(D))
        in_proj_w = jax.random.normal(ks[0], (3 * D, D), jnp.float32) * sc   # PyTorch layout
        in_proj_b = jax.random.normal(ks[1], (3 * D,), jnp.float32) * 0.01
        out_w = jax.random.normal(ks[2], (D, D), jnp.float32) * sc
        out_b = jax.random.normal(ks[3], (D,), jnp.float32) * 0.01
        w1_ = jax.random.normal(ks[4], (F, D), jnp.float32) * sc
        b1_ = jax.random.normal(ks[5], (F,), jnp.float32) * 0.01
        w2_ = jax.random.normal(ks[6], (D, F), jnp.float32) * (1.0 / jnp.sqrt(jnp.float32(F)))
        b2_ = jax.random.normal(ks[7], (D,), jnp.float32) * 0.01

        # x @ in_proj_w.T layout; fold the attention scale into the Q columns / bias so the
        # kernel never multiplies the (S, S) scores by 1/sqrt(hd).
        wqkv_l = in_proj_w.T                                      # (D, 3D)
        wqkv_l = jnp.concatenate([wqkv_l[:, :D] * attn_scale, wqkv_l[:, D:]], axis=1)
        bqkv_l = in_proj_b.reshape(1, 3 * D)
        bqkv_l = jnp.concatenate([bqkv_l[:, :D] * attn_scale, bqkv_l[:, D:]], axis=1)

        wqkv.append(wqkv_l)
        bqkv.append(bqkv_l)
        wo.append(out_w.T)                       # (D, D)
        bo.append(out_b.reshape(1, D))
        w1.append(w1_.T)                         # (D, F)
        b1.append(b1_.reshape(1, F))
        w2.append(w2_.T)                         # (F, D)
        b2.append(b2_.reshape(1, D))

    stack = lambda lst: jnp.stack(lst, axis=0)
    params = dict(
        wqkv=stack(wqkv).astype(jnp.bfloat16),
        bqkv=stack(bqkv),
        wo=stack(wo).astype(jnp.bfloat16),
        bo=stack(bo),
        ln1_w=jnp.ones((n_layers, 1, D), jnp.float32),
        ln1_b=jnp.zeros((n_layers, 1, D), jnp.float32),
        w1=stack(w1).astype(jnp.bfloat16),
        b1=stack(b1),
        w2=stack(w2).astype(jnp.bfloat16),
        b2=stack(b2),
        ln2_w=jnp.ones((n_layers, 1, D), jnp.float32),
        ln2_b=jnp.zeros((n_layers, 1, D), jnp.float32),
    )

    key, k1, k2 = jax.random.split(key, 3)
    dense_w = jax.random.normal(k1, (n_classes, D), jnp.float32) * (1.0 / jnp.sqrt(jnp.float32(D)))
    dense_b = jax.random.normal(k2, (n_classes,), jnp.float32) * 0.01
    C_PAD = 128                                   # lane-dense classifier output
    wd = jnp.zeros((D, C_PAD), jnp.float32).at[:, :n_classes].set(dense_w.T)
    bd = jnp.zeros((1, C_PAD), jnp.float32).at[:, :n_classes].set(dense_b)
    params['dense_w'] = wd.astype(jnp.bfloat16)
    params['dense_b'] = bd
    return params


# ------------------------------------------------------------------ demo
if __name__ == "__main__":
    # small shapes consistent with the module: n_channel == d_model, n_length == seq
    batch = 4
    d_model = 32       # n_channel
    nhead = 4
    dim_ff = 64
    n_classes = 2
    n_length = 16      # small stand-in for the module's n_length=1000

    key = jax.random.PRNGKey(0)
    key, kp, kx = jax.random.split(key, 3)
    params = init_params(kp, d_model, nhead, dim_ff, n_classes)
    x = jax.random.normal(kx, (batch, d_model, n_length), jnp.float32)

    fwd = jax.jit(functools.partial(transformer1d_forward, nhead=nhead, n_classes=n_classes))
    out = fwd(x, params)
    out = jax.block_until_ready(out)

    assert out.shape == (batch, n_classes)
    assert bool(jnp.all(jnp.isfinite(out)))
    print("KERNEL_OK")
</pallas_src>

<mosaic_0001>
module attributes {stable_mosaic.version = 11 : i64} {
  func.func @_fused_transformer_kernel(%arg0: i32, %arg1: i32, %arg2: memref<1x32x32xf32, #tpu.memory_space<vmem>>, %arg3: memref<6x32x96xbf16, #tpu.memory_space<vmem>>, %arg4: memref<6x1x96xf32, #tpu.memory_space<vmem>>, %arg5: memref<6x32x32xbf16, #tpu.memory_space<vmem>>, %arg6: memref<6x1x32xf32, #tpu.memory_space<vmem>>, %arg7: memref<6x1x32xf32, #tpu.memory_space<vmem>>, %arg8: memref<6x1x32xf32, #tpu.memory_space<vmem>>, %arg9: memref<6x32x64xbf16, #tpu.memory_space<vmem>>, %arg10: memref<6x1x64xf32, #tpu.memory_space<vmem>>, %arg11: memref<6x64x32xbf16, #tpu.memory_space<vmem>>, %arg12: memref<6x1x32xf32, #tpu.memory_space<vmem>>, %arg13: memref<6x1x32xf32, #tpu.memory_space<vmem>>, %arg14: memref<6x1x32xf32, #tpu.memory_space<vmem>>, %arg15: memref<32x128xbf16, #tpu.memory_space<vmem>>, %arg16: memref<1x128xf32, #tpu.memory_space<vmem>>, %arg17: memref<1x2x128xf32, #tpu.memory_space<vmem>>, %arg18: memref<32x32xf32, #tpu.memory_space<vmem>>) attributes {dimension_semantics = [#tpu.dimension_semantics<parallel>, #tpu.dimension_semantics<arbitrary>], iteration_bounds = array<i64: 2, 6>, scalar_prefetch = 0 : i64, scratch_operands = 1 : i64, tpu.core_type = #tpu.core_type<tc>, window_params = [{transform_indices = @transform_0, window_bounds = array<i64: 1, 32, 32>}, {pipeline_mode = #tpu.pipeline_mode<synchronous>, transform_indices = @transform_1, window_bounds = array<i64: 6, 32, 96>}, {pipeline_mode = #tpu.pipeline_mode<synchronous>, transform_indices = @transform_2, window_bounds = array<i64: 6, 1, 96>}, {pipeline_mode = #tpu.pipeline_mode<synchronous>, transform_indices = @transform_3, window_bounds = array<i64: 6, 32, 32>}, {pipeline_mode = #tpu.pipeline_mode<synchronous>, transform_indices = @transform_4, window_bounds = array<i64: 6, 1, 32>}, {pipeline_mode = #tpu.pipeline_mode<synchronous>, transform_indices = @transform_5, window_bounds = array<i64: 6, 1, 32>}, {pipeline_mode = #tpu.pipeline_mode<synchronous>, transform_indices = @transform_6, window_bounds = array<i64: 6, 1, 32>}, {pipeline_mode = #tpu.pipeline_mode<synchronous>, transform_indices = @transform_7, window_bounds = array<i64: 6, 32, 64>}, {pipeline_mode = #tpu.pipeline_mode<synchronous>, transform_indices = @transform_8, window_bounds = array<i64: 6, 1, 64>}, {pipeline_mode = #tpu.pipeline_mode<synchronous>, transform_indices = @transform_9, window_bounds = array<i64: 6, 64, 32>}, {pipeline_mode = #tpu.pipeline_mode<synchronous>, transform_indices = @transform_10, window_bounds = array<i64: 6, 1, 32>}, {pipeline_mode = #tpu.pipeline_mode<synchronous>, transform_indices = @transform_11, window_bounds = array<i64: 6, 1, 32>}, {pipeline_mode = #tpu.pipeline_mode<synchronous>, transform_indices = @transform_12, window_bounds = array<i64: 6, 1, 32>}, {pipeline_mode = #tpu.pipeline_mode<synchronous>, transform_indices = @transform_13, window_bounds = array<i64: 32, 128>}, {pipeline_mode = #tpu.pipeline_mode<synchronous>, transform_indices = @transform_14, window_bounds = array<i64: 1, 128>}, {transform_indices = @transform_15, window_bounds = array<i64: 1, 2, 128>}]} {
    %c0_i32 = arith.constant 0 : i32
    %0 = arith.cmpi eq, %arg1, %c0_i32 : i32
    %1 = arith.extui %0 : i1 to i32
    %c0_i32_0 = arith.constant 0 : i32
    %2 = arith.cmpi ne, %1, %c0_i32_0 : i32
    scf.if %2 {
      %c0_82 = arith.constant 0 : index
      %c0_83 = arith.constant 0 : index
      %c0_84 = arith.constant 0 : index
      %298 = vector.load %arg2[%c0_82, %c0_83, %c0_84] : memref<1x32x32xf32, #tpu.memory_space<vmem>>, vector<1x32x32xf32>
      %299 = vector.shape_cast %298 : vector<1x32x32xf32> to vector<32x32xf32>
      %c0_85 = arith.constant 0 : index
      %c0_86 = arith.constant 0 : index
      %300 = vector.load %arg18[%c0_85, %c0_86] : memref<32x32xf32, #tpu.memory_space<vmem>>, vector<32x32xf32>
      tpu.vector_store %arg18[%c0_85, %c0_86], %299 {strides = array<i32>} : memref<32x32xf32, #tpu.memory_space<vmem>>, vector<32x32xf32>,
    } else {
    }
    %3 = arith.index_cast %arg1 : i32 to index
    %c0 = arith.constant 0 : index
    %c0_1 = arith.constant 0 : index
    %4 = vector.load %arg3[%3, %c0, %c0_1] : memref<6x32x96xbf16, #tpu.memory_space<vmem>>, vector<1x32x96xbf16>
    %5 = vector.shape_cast %4 : vector<1x32x96xbf16> to vector<32x96xbf16>
    %6 = arith.index_cast %arg1 : i32 to index
    %c0_2 = arith.constant 0 : index
    %c0_3 = arith.constant 0 : index
    %7 = vector.load %arg4[%6, %c0_2, %c0_3] : memref<6x1x96xf32, #tpu.memory_space<vmem>>, vector<1x1x96xf32>
    %8 = vector.shape_cast %7 : vector<1x1x96xf32> to vector<1x96xf32>
    %9 = arith.index_cast %arg1 : i32 to index
    %c0_4 = arith.constant 0 : index
    %c0_5 = arith.constant 0 : index
    %10 = vector.load %arg5[%9, %c0_4, %c0_5] : memref<6x32x32xbf16, #tpu.memory_space<vmem>>, vector<1x32x32xbf16>
    %11 = vector.shape_cast %10 : vector<1x32x32xbf16> to vector<32x32xbf16>
    %12 = arith.index_cast %arg1 : i32 to index
    %c0_6 = arith.constant 0 : index
    %c0_7 = arith.constant 0 : index
    %13 = vector.load %arg6[%12, %c0_6, %c0_7] : memref<6x1x32xf32, #tpu.memory_space<vmem>>, vector<1x1x32xf32>
    %14 = vector.shape_cast %13 : vector<1x1x32xf32> to vector<1x32xf32>
    %15 = arith.index_cast %arg1 : i32 to index
    %c0_8 = arith.constant 0 : index
    %c0_9 = arith.constant 0 : index
    %16 = vector.load %arg7[%15, %c0_8, %c0_9] : memref<6x1x32xf32, #tpu.memory_space<vmem>>, vector<1x1x32xf32>
    %17 = vector.shape_cast %16 : vector<1x1x32xf32> to vector<1x32xf32>
    %18 = arith.index_cast %arg1 : i32 to index
    %c0_10 = arith.constant 0 : index
    %c0_11 = arith.constant 0 : index
    %19 = vector.load %arg8[%18, %c0_10, %c0_11] : memref<6x1x32xf32, #tpu.memory_space<vmem>>, vector<1x1x32xf32>
    %20 = vector.shape_cast %19 : vector<1x1x32xf32> to vector<1x32xf32>
    %21 = arith.index_cast %arg1 : i32 to index
    %c0_12 = arith.constant 0 : index
    %c0_13 = arith.constant 0 : index
    %22 = vector.load %arg9[%21, %c0_12, %c0_13] : memref<6x32x64xbf16, #tpu.memory_space<vmem>>, vector<1x32x64xbf16>
    %23 = vector.shape_cast %22 : vector<1x32x64xbf16> to vector<32x64xbf16>
    %24 = arith.index_cast %arg1 : i32 to index
    %c0_14 = arith.constant 0 : index
    %c0_15 = arith.constant 0 : index
    %25 = vector.load %arg10[%24, %c0_14, %c0_15] : memref<6x1x64xf32, #tpu.memory_space<vmem>>, vector<1x1x64xf32>
    %26 = vector.shape_cast %25 : vector<1x1x64xf32> to vector<1x64xf32>
    %27 = arith.index_cast %arg1 : i32 to index
    %c0_16 = arith.constant 0 : index
    %c0_17 = arith.constant 0 : index
    %28 = vector.load %arg11[%27, %c0_16, %c0_17] : memref<6x64x32xbf16, #tpu.memory_space<vmem>>, vector<1x64x32xbf16>
    %29 = vector.shape_cast %28 : vector<1x64x32xbf16> to vector<64x32xbf16>
    %30 = arith.index_cast %arg1 : i32 to index
    %c0_18 = arith.constant 0 : index
    %c0_19 = arith.constant 0 : index
    %31 = vector.load %arg12[%30, %c0_18, %c0_19] : memref<6x1x32xf32, #tpu.memory_space<vmem>>, vector<1x1x32xf32>
    %32 = vector.shape_cast %31 : vector<1x1x32xf32> to vector<1x32xf32>
    %33 = arith.index_cast %arg1 : i32 to index
    %c0_20 = arith.constant 0 : index
    %c0_21 = arith.constant 0 : index
    %34 = vector.load %arg13[%33, %c0_20, %c0_21] : memref<6x1x32xf32, #tpu.memory_space<vmem>>, vector<1x1x32xf32>
    %35 = vector.shape_cast %34 : vector<1x1x32xf32> to vector<1x32xf32>
    %36 = arith.index_cast %arg1 : i32 to index
    %c0_22 = arith.constant 0 : index
    %c0_23 = arith.constant 0 : index
    %37 = vector.load %arg14[%36, %c0_22, %c0_23] : memref<6x1x32xf32, #tpu.memory_space<vmem>>, vector<1x1x32xf32>
    %38 = vector.shape_cast %37 : vector<1x1x32xf32> to vector<1x32xf32>
    %c0_24 = arith.constant 0 : index
    %c0_25 = arith.constant 0 : index
    %39 = vector.load %arg18[%c0_24, %c0_25] : memref<32x32xf32, #tpu.memory_space<vmem>>, vector<32x32xf32>
    %40 = arith.truncf %39 : vector<32x32xf32> to vector<32x32xbf16>
    %cst = arith.constant dense<0.000000e+00> : vector<32x96xf32>
    %41 = tpu.matmul %40, %5, %cst {dimension_numbers = #tpu.dot_dimension_numbers<[1], [0], [0], [1], [0, 0, 1, 1], [], []>} : vector<32x32xbf16>, vector<32x96xbf16>, vector<32x96xf32> -> vector<32x96xf32>
    %42 = vector.broadcast %8 : vector<1x96xf32> to vector<32x96xf32>
    %43 = arith.addf %41, %42 : vector<32x96xf32>
    %44 = vector.extract_strided_slice %43 {offsets = [0, 0], sizes = [32, 32], strides = [1, 1]} : vector<32x96xf32> to vector<32x32xf32>
    %45 = vector.extract_strided_slice %43 {offsets = [0, 32], sizes = [32, 32], strides = [1, 1]} : vector<32x96xf32> to vector<32x32xf32>
    %46 = vector.extract_strided_slice %43 {offsets = [0, 64], sizes = [32, 32], strides = [1, 1]} : vector<32x96xf32> to vector<32x32xf32>
    %47 = vector.extract_strided_slice %44 {offsets = [0, 0], sizes = [16, 32], strides = [1, 1]} : vector<32x32xf32> to vector<16x32xf32>
    %48 = vector.extract_strided_slice %45 {offsets = [0, 0], sizes = [16, 32], strides = [1, 1]} : vector<32x32xf32> to vector<16x32xf32>
    %49 = vector.extract_strided_slice %46 {offsets = [0, 0], sizes = [16, 32], strides = [1, 1]} : vector<32x32xf32> to vector<16x32xf32>
    %50 = vector.extract_strided_slice %47 {offsets = [0, 0], sizes = [16, 8], strides = [1, 1]} : vector<16x32xf32> to vector<16x8xf32>
    %51 = arith.truncf %50 : vector<16x8xf32> to vector<16x8xbf16>
    %52 = vector.extract_strided_slice %48 {offsets = [0, 0], sizes = [16, 8], strides = [1, 1]} : vector<16x32xf32> to vector<16x8xf32>
    %53 = arith.truncf %52 : vector<16x8xf32> to vector<16x8xbf16>
    %54 = vector.extract_strided_slice %49 {offsets = [0, 0], sizes = [16, 8], strides = [1, 1]} : vector<16x32xf32> to vector<16x8xf32>
    %55 = arith.truncf %54 : vector<16x8xf32> to vector<16x8xbf16>
    %cst_26 = arith.constant dense<0.000000e+00> : vector<16x16xf32>
    %56 = tpu.matmul %51, %53, %cst_26 {dimension_numbers = #tpu.dot_dimension_numbers<[1], [1], [0], [0], [0, 0, 1, 0], [], []>} : vector<16x8xbf16>, vector<16x8xbf16>, vector<16x16xf32> -> vector<16x16xf32>
    %cst_27 = arith.constant dense<0xFF800000> : vector<16xf32>
    %57 = vector.multi_reduction <maximumf>, %56, %cst_27 [1] : vector<16x16xf32> to vector<16xf32>
    %58 = vector.shape_cast %57 : vector<16xf32> to vector<16x1xf32>
    %59 = vector.broadcast %58 : vector<16x1xf32> to vector<16x16xf32>
    %60 = arith.subf %56, %59 : vector<16x16xf32>
    %61 = math.exp %60 : vector<16x16xf32>
    %cst_28 = arith.constant dense<0.000000e+00> : vector<16xf32>
    %62 = vector.multi_reduction <add>, %61, %cst_28 [1] : vector<16x16xf32> to vector<16xf32>
    %63 = vector.shape_cast %62 : vector<16xf32> to vector<16x1xf32>
    %64 = arith.truncf %61 : vector<16x16xf32> to vector<16x16xbf16>
    %cst_29 = arith.constant dense<0.000000e+00> : vector<16x8xf32>
    %65 = tpu.matmul %64, %55, %cst_29 {dimension_numbers = #tpu.dot_dimension_numbers<[1], [0], [0], [1], [0, 0, 1, 1], [], []>} : vector<16x16xbf16>, vector<16x8xbf16>, vector<16x8xf32> -> vector<16x8xf32>
    %66 = tpu.reciprocal %63 {approx = true} : vector<16x1xf32> -> vector<16x1xf32>
    %67 = vector.broadcast %66 : vector<16x1xf32> to vector<16x8xf32>
    %68 = arith.mulf %65, %67 : vector<16x8xf32>
    %69 = arith.truncf %68 : vector<16x8xf32> to vector<16x8xbf16>
    %70 = vector.extract_strided_slice %11 {offsets = [0, 0], sizes = [8, 32], strides = [1, 1]} : vector<32x32xbf16> to vector<8x32xbf16>
    %cst_30 = arith.constant dense<0.000000e+00> : vector<16x32xf32>
    %71 = tpu.matmul %69, %70, %cst_30 {dimension_numbers = #tpu.dot_dimension_numbers<[1], [0], [0], [1], [0, 0, 1, 1], [], []>} : vector<16x8xbf16>, vector<8x32xbf16>, vector<16x32xf32> -> vector<16x32xf32>
    %72 = vector.extract_strided_slice %47 {offsets = [0, 8], sizes = [16, 8], strides = [1, 1]} : vector<16x32xf32> to vector<16x8xf32>
    %73 = arith.truncf %72 : vector<16x8xf32> to vector<16x8xbf16>
    %74 = vector.extract_strided_slice %48 {offsets = [0, 8], sizes = [16, 8], strides = [1, 1]} : vector<16x32xf32> to vector<16x8xf32>
    %75 = arith.truncf %74 : vector<16x8xf32> to vector<16x8xbf16>
    %76 = vector.extract_strided_slice %49 {offsets = [0, 8], sizes = [16, 8], strides = [1, 1]} : vector<16x32xf32> to vector<16x8xf32>
    %77 = arith.truncf %76 : vector<16x8xf32> to vector<16x8xbf16>
    %cst_31 = arith.constant dense<0.000000e+00> : vector<16x16xf32>
    %78 = tpu.matmul %73, %75, %cst_31 {dimension_numbers = #tpu.dot_dimension_numbers<[1], [1], [0], [0], [0, 0, 1, 0], [], []>} : vector<16x8xbf16>, vector<16x8xbf16>, vector<16x16xf32> -> vector<16x16xf32>
    %cst_32 = arith.constant dense<0xFF800000> : vector<16xf32>
    %79 = vector.multi_reduction <maximumf>, %78, %cst_32 [1] : vector<16x16xf32> to vector<16xf32>
    %80 = vector.shape_cast %79 : vector<16xf32> to vector<16x1xf32>
    %81 = vector.broadcast %80 : vector<16x1xf32> to vector<16x16xf32>
    %82 = arith.subf %78, %81 : vector<16x16xf32>
    %83 = math.exp %82 : vector<16x16xf32>
    %cst_33 = arith.constant dense<0.000000e+00> : vector<16xf32>
    %84 = vector.multi_reduction <add>, %83, %cst_33 [1] : vector<16x16xf32> to vector<16xf32>
    %85 = vector.shape_cast %84 : vector<16xf32> to vector<16x1xf32>
    %86 = arith.truncf %83 : vector<16x16xf32> to vector<16x16xbf16>
    %cst_34 = arith.constant dense<0.000000e+00> : vector<16x8xf32>
    %87 = tpu.matmul %86, %77, %cst_34 {dimension_numbers = #tpu.dot_dimension_numbers<[1], [0], [0], [1], [0, 0, 1, 1], [], []>} : vector<16x16xbf16>, vector<16x8xbf16>, vector<16x8xf32> -> vector<16x8xf32>
    %88 = tpu.reciprocal %85 {approx = true} : vector<16x1xf32> -> vector<16x1xf32>
    %89 = vector.broadcast %88 : vector<16x1xf32> to vector<16x8xf32>
    %90 = arith.mulf %87, %89 : vector<16x8xf32>
    %91 = arith.truncf %90 : vector<16x8xf32> to vector<16x8xbf16>
    %92 = vector.extract_strided_slice %11 {offsets = [8, 0], sizes = [8, 32], strides = [1, 1]} : vector<32x32xbf16> to vector<8x32xbf16>
    %cst_35 = arith.constant dense<0.000000e+00> : vector<16x32xf32>
    %93 = tpu.matmul %91, %92, %cst_35 {dimension_numbers = #tpu.dot_dimension_numbers<[1], [0], [0], [1], [0, 0, 1, 1], [], []>} : vector<16x8xbf16>, vector<8x32xbf16>, vector<16x32xf32> -> vector<16x32xf32>
    %94 = arith.addf %71, %93 : vector<16x32xf32>
    %95 = vector.extract_strided_slice %47 {offsets = [0, 16], sizes = [16, 8], strides = [1, 1]} : vector<16x32xf32> to vector<16x8xf32>
    %96 = arith.truncf %95 : vector<16x8xf32> to vector<16x8xbf16>
    %97 = vector.extract_strided_slice %48 {offsets = [0, 16], sizes = [16, 8], strides = [1, 1]} : vector<16x32xf32> to vector<16x8xf32>
    %98 = arith.truncf %97 : vector<16x8xf32> to vector<16x8xbf16>
    %99 = vector.extract_strided_slice %49 {offsets = [0, 16], sizes = [16, 8], strides = [1, 1]} : vector<16x32xf32> to vector<16x8xf32>
    %100 = arith.truncf %99 : vector<16x8xf32> to vector<16x8xbf16>
    %cst_36 = arith.constant dense<0.000000e+00> : vector<16x16xf32>
    %101 = tpu.matmul %96, %98, %cst_36 {dimension_numbers = #tpu.dot_dimension_numbers<[1], [1], [0], [0], [0, 0, 1, 0], [], []>} : vector<16x8xbf16>, vector<16x8xbf16>, vector<16x16xf32> -> vector<16x16xf32>
    %cst_37 = arith.constant dense<0xFF800000> : vector<16xf32>
    %102 = vector.multi_reduction <maximumf>, %101, %cst_37 [1] : vector<16x16xf32> to vector<16xf32>
    %103 = vector.shape_cast %102 : vector<16xf32> to vector<16x1xf32>
    %104 = vector.broadcast %103 : vector<16x1xf32> to vector<16x16xf32>
    %105 = arith.subf %101, %104 : vector<16x16xf32>
    %106 = math.exp %105 : vector<16x16xf32>
    %cst_38 = arith.constant dense<0.000000e+00> : vector<16xf32>
    %107 = vector.multi_reduction <add>, %106, %cst_38 [1] : vector<16x16xf32> to vector<16xf32>
    %108 = vector.shape_cast %107 : vector<16xf32> to vector<16x1xf32>
    %109 = arith.truncf %106 : vector<16x16xf32> to vector<16x16xbf16>
    %cst_39 = arith.constant dense<0.000000e+00> : vector<16x8xf32>
    %110 = tpu.matmul %109, %100, %cst_39 {dimension_numbers = #tpu.dot_dimension_numbers<[1], [0], [0], [1], [0, 0, 1, 1], [], []>} : vector<16x16xbf16>, vector<16x8xbf16>, vector<16x8xf32> -> vector<16x8xf32>
    %111 = tpu.reciprocal %108 {approx = true} : vector<16x1xf32> -> vector<16x1xf32>
    %112 = vector.broadcast %111 : vector<16x1xf32> to vector<16x8xf32>
    %113 = arith.mulf %110, %112 : vector<16x8xf32>
    %114 = arith.truncf %113 : vector<16x8xf32> to vector<16x8xbf16>
    %115 = vector.extract_strided_slice %11 {offsets = [16, 0], sizes = [8, 32], strides = [1, 1]} : vector<32x32xbf16> to vector<8x32xbf16>
    %cst_40 = arith.constant dense<0.000000e+00> : vector<16x32xf32>
    %116 = tpu.matmul %114, %115, %cst_40 {dimension_numbers = #tpu.dot_dimension_numbers<[1], [0], [0], [1], [0, 0, 1, 1], [], []>} : vector<16x8xbf16>, vector<8x32xbf16>, vector<16x32xf32> -> vector<16x32xf32>
    %117 = arith.addf %94, %116 : vector<16x32xf32>
    %118 = vector.extract_strided_slice %47 {offsets = [0, 24], sizes = [16, 8], strides = [1, 1]} : vector<16x32xf32> to vector<16x8xf32>
    %119 = arith.truncf %118 : vector<16x8xf32> to vector<16x8xbf16>
    %120 = vector.extract_strided_slice %48 {offsets = [0, 24], sizes = [16, 8], strides = [1, 1]} : vector<16x32xf32> to vector<16x8xf32>
    %121 = arith.truncf %120 : vector<16x8xf32> to vector<16x8xbf16>
    %122 = vector.extract_strided_slice %49 {offsets = [0, 24], sizes = [16, 8], strides = [1, 1]} : vector<16x32xf32> to vector<16x8xf32>
    %123 = arith.truncf %122 : vector<16x8xf32> to vector<16x8xbf16>
    %cst_41 = arith.constant dense<0.000000e+00> : vector<16x16xf32>
    %124 = tpu.matmul %119, %121, %cst_41 {dimension_numbers = #tpu.dot_dimension_numbers<[1], [1], [0], [0], [0, 0, 1, 0], [], []>} : vector<16x8xbf16>, vector<16x8xbf16>, vector<16x16xf32> -> vector<16x16xf32>
    %cst_42 = arith.constant dense<0xFF800000> : vector<16xf32>
    %125 = vector.multi_reduction <maximumf>, %124, %cst_42 [1] : vector<16x16xf32> to vector<16xf32>
    %126 = vector.shape_cast %125 : vector<16xf32> to vector<16x1xf32>
    %127 = vector.broadcast %126 : vector<16x1xf32> to vector<16x16xf32>
    %128 = arith.subf %124, %127 : vector<16x16xf32>
    %129 = math.exp %128 : vector<16x16xf32>
    %cst_43 = arith.constant dense<0.000000e+00> : vector<16xf32>
    %130 = vector.multi_reduction <add>, %129, %cst_43 [1] : vector<16x16xf32> to vector<16xf32>
    %131 = vector.shape_cast %130 : vector<16xf32> to vector<16x1xf32>
    %132 = arith.truncf %129 : vector<16x16xf32> to vector<16x16xbf16>
    %cst_44 = arith.constant dense<0.000000e+00> : vector<16x8xf32>
    %133 = tpu.matmul %132, %123, %cst_44 {dimension_numbers = #tpu.dot_dimension_numbers<[1], [0], [0], [1], [0, 0, 1, 1], [], []>} : vector<16x16xbf16>, vector<16x8xbf16>, vector<16x8xf32> -> vector<16x8xf32>
    %134 = tpu.reciprocal %131 {approx = true} : vector<16x1xf32> -> vector<16x1xf32>
    %135 = vector.broadcast %134 : vector<16x1xf32> to vector<16x8xf32>
    %136 = arith.mulf %133, %135 : vector<16x8xf32>
    %137 = arith.truncf %136 : vector<16x8xf32> to vector<16x8xbf16>
    %138 = vector.extract_strided_slice %11 {offsets = [24, 0], sizes = [8, 32], strides = [1, 1]} : vector<32x32xbf16> to vector<8x32xbf16>
    %cst_45 = arith.constant dense<0.000000e+00> : vector<16x32xf32>
    %139 = tpu.matmul %137, %138, %cst_45 {dimension_numbers = #tpu.dot_dimension_numbers<[1], [0], [0], [1], [0, 0, 1, 1], [], []>} : vector<16x8xbf16>, vector<8x32xbf16>, vector<16x32xf32> -> vector<16x32xf32>
    %140 = arith.addf %117, %139 : vector<16x32xf32>
    %141 = vector.extract_strided_slice %44 {offsets = [16, 0], sizes = [16, 32], strides = [1, 1]} : vector<32x32xf32> to vector<16x32xf32>
    %142 = vector.extract_strided_slice %45 {offsets = [16, 0], sizes = [16, 32], strides = [1, 1]} : vector<32x32xf32> to vector<16x32xf32>
    %143 = vector.extract_strided_slice %46 {offsets = [16, 0], sizes = [16, 32], strides = [1, 1]} : vector<32x32xf32> to vector<16x32xf32>
    %144 = vector.extract_strided_slice %141 {offsets = [0, 0], sizes = [16, 8], strides = [1, 1]} : vector<16x32xf32> to vector<16x8xf32>
    %145 = arith.truncf %144 : vector<16x8xf32> to vector<16x8xbf16>
    %146 = vector.extract_strided_slice %142 {offsets = [0, 0], sizes = [16, 8], strides = [1, 1]} : vector<16x32xf32> to vector<16x8xf32>
    %147 = arith.truncf %146 : vector<16x8xf32> to vector<16x8xbf16>
    %148 = vector.extract_strided_slice %143 {offsets = [0, 0], sizes = [16, 8], strides = [1, 1]} : vector<16x32xf32> to vector<16x8xf32>
    %149 = arith.truncf %148 : vector<16x8xf32> to vector<16x8xbf16>
    %cst_46 = arith.constant dense<0.000000e+00> : vector<16x16xf32>
    %150 = tpu.matmul %145, %147, %cst_46 {dimension_numbers = #tpu.dot_dimension_numbers<[1], [1], [0], [0], [0, 0, 1, 0], [], []>} : vector<16x8xbf16>, vector<16x8xbf16>, vector<16x16xf32> -> vector<16x16xf32>
    %cst_47 = arith.constant dense<0xFF800000> : vector<16xf32>
    %151 = vector.multi_reduction <maximumf>, %150, %cst_47 [1] : vector<16x16xf32> to vector<16xf32>
    %152 = vector.shape_cast %151 : vector<16xf32> to vector<16x1xf32>
    %153 = vector.broadcast %152 : vector<16x1xf32> to vector<16x16xf32>
    %154 = arith.subf %150, %153 : vector<16x16xf32>
    %155 = math.exp %154 : vector<16x16xf32>
    %cst_48 = arith.constant dense<0.000000e+00> : vector<16xf32>
    %156 = vector.multi_reduction <add>, %155, %cst_48 [1] : vector<16x16xf32> to vector<16xf32>
    %157 = vector.shape_cast %156 : vector<16xf32> to vector<16x1xf32>
    %158 = arith.truncf %155 : vector<16x16xf32> to vector<16x16xbf16>
    %cst_49 = arith.constant dense<0.000000e+00> : vector<16x8xf32>
    %159 = tpu.matmul %158, %149, %cst_49 {dimension_numbers = #tpu.dot_dimension_numbers<[1], [0], [0], [1], [0, 0, 1, 1], [], []>} : vector<16x16xbf16>, vector<16x8xbf16>, vector<16x8xf32> -> vector<16x8xf32>
    %160 = tpu.reciprocal %157 {approx = true} : vector<16x1xf32> -> vector<16x1xf32>
    %161 = vector.broadcast %160 : vector<16x1xf32> to vector<16x8xf32>
    %162 = arith.mulf %159, %161 : vector<16x8xf32>
    %163 = arith.truncf %162 : vector<16x8xf32> to vector<16x8xbf16>
    %164 = vector.extract_strided_slice %11 {offsets = [0, 0], sizes = [8, 32], strides = [1, 1]} : vector<32x32xbf16> to vector<8x32xbf16>
    %cst_50 = arith.constant dense<0.000000e+00> : vector<16x32xf32>
    %165 = tpu.matmul %163, %164, %cst_50 {dimension_numbers = #tpu.dot_dimension_numbers<[1], [0], [0], [1], [0, 0, 1, 1], [], []>} : vector<16x8xbf16>, vector<8x32xbf16>, vector<16x32xf32> -> vector<16x32xf32>
    %166 = vector.extract_strided_slice %141 {offsets = [0, 8], sizes = [16, 8], strides = [1, 1]} : vector<16x32xf32> to vector<16x8xf32>
    %167 = arith.truncf %166 : vector<16x8xf32> to vector<16x8xbf16>
    %168 = vector.extract_strided_slice %142 {offsets = [0, 8], sizes = [16, 8], strides = [1, 1]} : vector<16x32xf32> to vector<16x8xf32>
    %169 = arith.truncf %168 : vector<16x8xf32> to vector<16x8xbf16>
    %170 = vector.extract_strided_slice %143 {offsets = [0, 8], sizes = [16, 8], strides = [1, 1]} : vector<16x32xf32> to vector<16x8xf32>
    %171 = arith.truncf %170 : vector<16x8xf32> to vector<16x8xbf16>
    %cst_51 = arith.constant dense<0.000000e+00> : vector<16x16xf32>
    %172 = tpu.matmul %167, %169, %cst_51 {dimension_numbers = #tpu.dot_dimension_numbers<[1], [1], [0], [0], [0, 0, 1, 0], [], []>} : vector<16x8xbf16>, vector<16x8xbf16>, vector<16x16xf32> -> vector<16x16xf32>
    %cst_52 = arith.constant dense<0xFF800000> : vector<16xf32>
    %173 = vector.multi_reduction <maximumf>, %172, %cst_52 [1] : vector<16x16xf32> to vector<16xf32>
    %174 = vector.shape_cast %173 : vector<16xf32> to vector<16x1xf32>
    %175 = vector.broadcast %174 : vector<16x1xf32> to vector<16x16xf32>
    %176 = arith.subf %172, %175 : vector<16x16xf32>
    %177 = math.exp %176 : vector<16x16xf32>
    %cst_53 = arith.constant dense<0.000000e+00> : vector<16xf32>
    %178 = vector.multi_reduction <add>, %177, %cst_53 [1] : vector<16x16xf32> to vector<16xf32>
    %179 = vector.shape_cast %178 : vector<16xf32> to vector<16x1xf32>
    %180 = arith.truncf %177 : vector<16x16xf32> to vector<16x16xbf16>
    %cst_54 = arith.constant dense<0.000000e+00> : vector<16x8xf32>
    %181 = tpu.matmul %180, %171, %cst_54 {dimension_numbers = #tpu.dot_dimension_numbers<[1], [0], [0], [1], [0, 0, 1, 1], [], []>} : vector<16x16xbf16>, vector<16x8xbf16>, vector<16x8xf32> -> vector<16x8xf32>
    %182 = tpu.reciprocal %179 {approx = true} : vector<16x1xf32> -> vector<16x1xf32>
    %183 = vector.broadcast %182 : vector<16x1xf32> to vector<16x8xf32>
    %184 = arith.mulf %181, %183 : vector<16x8xf32>
    %185 = arith.truncf %184 : vector<16x8xf32> to vector<16x8xbf16>
    %186 = vector.extract_strided_slice %11 {offsets = [8, 0], sizes = [8, 32], strides = [1, 1]} : vector<32x32xbf16> to vector<8x32xbf16>
    %cst_55 = arith.constant dense<0.000000e+00> : vector<16x32xf32>
    %187 = tpu.matmul %185, %186, %cst_55 {dimension_numbers = #tpu.dot_dimension_numbers<[1], [0], [0], [1], [0, 0, 1, 1], [], []>} : vector<16x8xbf16>, vector<8x32xbf16>, vector<16x32xf32> -> vector<16x32xf32>
    %188 = arith.addf %165, %187 : vector<16x32xf32>
    %189 = vector.extract_strided_slice %141 {offsets = [0, 16], sizes = [16, 8], strides = [1, 1]} : vector<16x32xf32> to vector<16x8xf32>
    %190 = arith.truncf %189 : vector<16x8xf32> to vector<16x8xbf16>
    %191 = vector.extract_strided_slice %142 {offsets = [0, 16], sizes = [16, 8], strides = [1, 1]} : vector<16x32xf32> to vector<16x8xf32>
    %192 = arith.truncf %191 : vector<16x8xf32> to vector<16x8xbf16>
    %193 = vector.extract_strided_slice %143 {offsets = [0, 16], sizes = [16, 8], strides = [1, 1]} : vector<16x32xf32> to vector<16x8xf32>
    %194 = arith.truncf %193 : vector<16x8xf32> to vector<16x8xbf16>
    %cst_56 = arith.constant dense<0.000000e+00> : vector<16x16xf32>
    %195 = tpu.matmul %190, %192, %cst_56 {dimension_numbers = #tpu.dot_dimension_numbers<[1], [1], [0], [0], [0, 0, 1, 0], [], []>} : vector<16x8xbf16>, vector<16x8xbf16>, vector<16x16xf32> -> vector<16x16xf32>
    %cst_57 = arith.constant dense<0xFF800000> : vector<16xf32>
    %196 = vector.multi_reduction <maximumf>, %195, %cst_57 [1] : vector<16x16xf32> to vector<16xf32>
    %197 = vector.shape_cast %196 : vector<16xf32> to vector<16x1xf32>
    %198 = vector.broadcast %197 : vector<16x1xf32> to vector<16x16xf32>
    %199 = arith.subf %195, %198 : vector<16x16xf32>
    %200 = math.exp %199 : vector<16x16xf32>
    %cst_58 = arith.constant dense<0.000000e+00> : vector<16xf32>
    %201 = vector.multi_reduction <add>, %200, %cst_58 [1] : vector<16x16xf32> to vector<16xf32>
    %202 = vector.shape_cast %201 : vector<16xf32> to vector<16x1xf32>
    %203 = arith.truncf %200 : vector<16x16xf32> to vector<16x16xbf16>
    %cst_59 = arith.constant dense<0.000000e+00> : vector<16x8xf32>
    %204 = tpu.matmul %203, %194, %cst_59 {dimension_numbers = #tpu.dot_dimension_numbers<[1], [0], [0], [1], [0, 0, 1, 1], [], []>} : vector<16x16xbf16>, vector<16x8xbf16>, vector<16x8xf32> -> vector<16x8xf32>
    %205 = tpu.reciprocal %202 {approx = true} : vector<16x1xf32> -> vector<16x1xf32>
    %206 = vector.broadcast %205 : vector<16x1xf32> to vector<16x8xf32>
    %207 = arith.mulf %204, %206 : vector<16x8xf32>
    %208 = arith.truncf %207 : vector<16x8xf32> to vector<16x8xbf16>
    %209 = vector.extract_strided_slice %11 {offsets = [16, 0], sizes = [8, 32], strides = [1, 1]} : vector<32x32xbf16> to vector<8x32xbf16>
    %cst_60 = arith.constant dense<0.000000e+00> : vector<16x32xf32>
    %210 = tpu.matmul %208, %209, %cst_60 {dimension_numbers = #tpu.dot_dimension_numbers<[1], [0], [0], [1], [0, 0, 1, 1], [], []>} : vector<16x8xbf16>, vector<8x32xbf16>, vector<16x32xf32> -> vector<16x32xf32>
    %211 = arith.addf %188, %210 : vector<16x32xf32>
    %212 = vector.extract_strided_slice %141 {offsets = [0, 24], sizes = [16, 8], strides = [1, 1]} : vector<16x32xf32> to vector<16x8xf32>
    %213 = arith.truncf %212 : vector<16x8xf32> to vector<16x8xbf16>
    %214 = vector.extract_strided_slice %142 {offsets = [0, 24], sizes = [16, 8], strides = [1, 1]} : vector<16x32xf32> to vector<16x8xf32>
    %215 = arith.truncf %214 : vector<16x8xf32> to vector<16x8xbf16>
    %216 = vector.extract_strided_slice %143 {offsets = [0, 24], sizes = [16, 8], strides = [1, 1]} : vector<16x32xf32> to vector<16x8xf32>
    %217 = arith.truncf %216 : vector<16x8xf32> to vector<16x8xbf16>
    %cst_61 = arith.constant dense<0.000000e+00> : vector<16x16xf32>
    %218 = tpu.matmul %213, %215, %cst_61 {dimension_numbers = #tpu.dot_dimension_numbers<[1], [1], [0], [0], [0, 0, 1, 0], [], []>} : vector<16x8xbf16>, vector<16x8xbf16>, vector<16x16xf32> -> vector<16x16xf32>
    %cst_62 = arith.constant dense<0xFF800000> : vector<16xf32>
    %219 = vector.multi_reduction <maximumf>, %218, %cst_62 [1] : vector<16x16xf32> to vector<16xf32>
    %220 = vector.shape_cast %219 : vector<16xf32> to vector<16x1xf32>
    %221 = vector.broadcast %220 : vector<16x1xf32> to vector<16x16xf32>
    %222 = arith.subf %218, %221 : vector<16x16xf32>
    %223 = math.exp %222 : vector<16x16xf32>
    %cst_63 = arith.constant dense<0.000000e+00> : vector<16xf32>
    %224 = vector.multi_reduction <add>, %223, %cst_63 [1] : vector<16x16xf32> to vector<16xf32>
    %225 = vector.shape_cast %224 : vector<16xf32> to vector<16x1xf32>
    %226 = arith.truncf %223 : vector<16x16xf32> to vector<16x16xbf16>
    %cst_64 = arith.constant dense<0.000000e+00> : vector<16x8xf32>
    %227 = tpu.matmul %226, %217, %cst_64 {dimension_numbers = #tpu.dot_dimension_numbers<[1], [0], [0], [1], [0, 0, 1, 1], [], []>} : vector<16x16xbf16>, vector<16x8xbf16>, vector<16x8xf32> -> vector<16x8xf32>
    %228 = tpu.reciprocal %225 {approx = true} : vector<16x1xf32> -> vector<16x1xf32>
    %229 = vector.broadcast %228 : vector<16x1xf32> to vector<16x8xf32>
    %230 = arith.mulf %227, %229 : vector<16x8xf32>
    %231 = arith.truncf %230 : vector<16x8xf32> to vector<16x8xbf16>
    %232 = vector.extract_strided_slice %11 {offsets = [24, 0], sizes = [8, 32], strides = [1, 1]} : vector<32x32xbf16> to vector<8x32xbf16>
    %cst_65 = arith.constant dense<0.000000e+00> : vector<16x32xf32>
    %233 = tpu.matmul %231, %232, %cst_65 {dimension_numbers = #tpu.dot_dimension_numbers<[1], [0], [0], [1], [0, 0, 1, 1], [], []>} : vector<16x8xbf16>, vector<8x32xbf16>, vector<16x32xf32> -> vector<16x32xf32>
    %234 = arith.addf %211, %233 : vector<16x32xf32>
    %235 = tpu.concatenate %140, %234 in 0 : vector<16x32xf32>, vector<16x32xf32> -> vector<32x32xf32>
    %236 = vector.broadcast %14 : vector<1x32xf32> to vector<32x32xf32>
    %237 = arith.addf %235, %236 : vector<32x32xf32>
    %238 = arith.addf %39, %237 : vector<32x32xf32>
    %cst_66 = arith.constant dense<0.000000e+00> : vector<32xf32>
    %239 = vector.multi_reduction <add>, %238, %cst_66 [1] : vector<32x32xf32> to vector<32xf32>
    %240 = vector.shape_cast %239 : vector<32xf32> to vector<32x1xf32>
    %cst_67 = arith.constant 3.200000e+01 : f32
    %241 = vector.broadcast %cst_67 : f32 to vector<32x1xf32>
    %242 = arith.divf %240, %241 : vector<32x1xf32>
    %243 = vector.broadcast %242 : vector<32x1xf32> to vector<32x32xf32>
    %244 = arith.subf %238, %243 : vector<32x32xf32>
    %245 = arith.mulf %244, %244 : vector<32x32xf32>
    %cst_68 = arith.constant dense<0.000000e+00> : vector<32xf32>
    %246 = vector.multi_reduction <add>, %245, %cst_68 [1] : vector<32x32xf32> to vector<32xf32>
    %247 = vector.shape_cast %246 : vector<32xf32> to vector<32x1xf32>
    %cst_69 = arith.constant 3.200000e+01 : f32
    %248 = vector.broadcast %cst_69 : f32 to vector<32x1xf32>
    %249 = arith.divf %247, %248 : vector<32x1xf32>
    %250 = vector.broadcast %242 : vector<32x1xf32> to vector<32x32xf32>
    %251 = arith.subf %238, %250 : vector<32x32xf32>
    %cst_70 = arith.constant 9.99999974E-6 : f32
    %252 = vector.broadcast %cst_70 : f32 to vector<32x1xf32>
    %253 = arith.addf %249, %252 : vector<32x1xf32>
    %254 = math.rsqrt %253 : vector<32x1xf32>
    %255 = vector.broadcast %254 : vector<32x1xf32> to vector<32x32xf32>
    %256 = arith.mulf %251, %255 : vector<32x32xf32>
    %257 = vector.broadcast %17 : vector<1x32xf32> to vector<32x32xf32>
    %258 = arith.mulf %256, %257 : vector<32x32xf32>
    %259 = vector.broadcast %20 : vector<1x32xf32> to vector<32x32xf32>
    %260 = arith.addf %258, %259 : vector<32x32xf32>
    %261 = arith.truncf %260 : vector<32x32xf32> to vector<32x32xbf16>
    %cst_71 = arith.constant dense<0.000000e+00> : vector<32x64xf32>
    %262 = tpu.matmul %261, %23, %cst_71 {dimension_numbers = #tpu.dot_dimension_numbers<[1], [0], [0], [1], [0, 0, 1, 1], [], []>} : vector<32x32xbf16>, vector<32x64xbf16>, vector<32x64xf32> -> vector<32x64xf32>
    %263 = vector.broadcast %26 : vector<1x64xf32> to vector<32x64xf32>
    %264 = arith.addf %262, %263 : vector<32x64xf32>
    %cst_72 = arith.constant 0.000000e+00 : f32
    %265 = vector.broadcast %cst_72 : f32 to vector<32x64xf32>
    %266 = arith.maximumf %264, %265 : vector<32x64xf32>
    %267 = arith.truncf %266 : vector<32x64xf32> to vector<32x64xbf16>
    %cst_73 = arith.constant dense<0.000000e+00> : vector<32x32xf32>
    %268 = tpu.matmul %267, %29, %cst_73 {dimension_numbers = #tpu.dot_dimension_numbers<[1], [0], [0], [1], [0, 0, 1, 1], [], []>} : vector<32x64xbf16>, vector<64x32xbf16>, vector<32x32xf32> -> vector<32x32xf32>
    %269 = vector.broadcast %32 : vector<1x32xf32> to vector<32x32xf32>
    %270 = arith.addf %268, %269 : vector<32x32xf32>
    %271 = arith.addf %260, %270 : vector<32x32xf32>
    %cst_74 = arith.constant dense<0.000000e+00> : vector<32xf32>
    %272 = vector.multi_reduction <add>, %271, %cst_74 [1] : vector<32x32xf32> to vector<32xf32>
    %273 = vector.shape_cast %272 : vector<32xf32> to vector<32x1xf32>
    %cst_75 = arith.constant 3.200000e+01 : f32
    %274 = vector.broadcast %cst_75 : f32 to vector<32x1xf32>
    %275 = arith.divf %273, %274 : vector<32x1xf32>
    %276 = vector.broadcast %275 : vector<32x1xf32> to vector<32x32xf32>
    %277 = arith.subf %271, %276 : vector<32x32xf32>
    %278 = arith.mulf %277, %277 : vector<32x32xf32>
    %cst_76 = arith.constant dense<0.000000e+00> : vector<32xf32>
    %279 = vector.multi_reduction <add>, %278, %cst_76 [1] : vector<32x32xf32> to vector<32xf32>
    %280 = vector.shape_cast %279 : vector<32xf32> to vector<32x1xf32>
    %cst_77 = arith.constant 3.200000e+01 : f32
    %281 = vector.broadcast %cst_77 : f32 to vector<32x1xf32>
    %282 = arith.divf %280, %281 : vector<32x1xf32>
    %283 = vector.broadcast %275 : vector<32x1xf32> to vector<32x32xf32>
    %284 = arith.subf %271, %283 : vector<32x32xf32>
    %cst_78 = arith.constant 9.99999974E-6 : f32
    %285 = vector.broadcast %cst_78 : f32 to vector<32x1xf32>
    %286 = arith.addf %282, %285 : vector<32x1xf32>
    %287 = math.rsqrt %286 : vector<32x1xf32>
    %288 = vector.broadcast %287 : vector<32x1xf32> to vector<32x32xf32>
    %289 = arith.mulf %284, %288 : vector<32x32xf32>
    %290 = vector.broadcast %35 : vector<1x32xf32> to vector<32x32xf32>
    %291 = arith.mulf %289, %290 : vector<32x32xf32>
    %292 = vector.broadcast %38 : vector<1x32xf32> to vector<32x32xf32>
    %293 = arith.addf %291, %292 : vector<32x32xf32>
    %c0_79 = arith.constant 0 : index
    %c0_80 = arith.constant 0 : index
    %294 = vector.load %arg18[%c0_79, %c0_80] : memref<32x32xf32, #tpu.memory_space<vmem>>, vector<32x32xf32>
    tpu.vector_store %arg18[%c0_79, %c0_80], %293 {strides = array<i32>} : memref<32x32xf32, #tpu.memory_space<vmem>>, vector<32x32xf32>,
    %c5_i32 = arith.constant 5 : i32
    %295 = arith.cmpi eq, %arg1, %c5_i32 : i32
    %296 = arith.extui %295 : i1 to i32
    %c0_i32_81 = arith.constant 0 : i32
    %297 = arith.cmpi ne, %296, %c0_i32_81 : i32
    scf.if %297 {
      %298 = vector.extract_strided_slice %293 {offsets = [0, 0], sizes = [16, 32], strides = [1, 1]} : vector<32x32xf32> to vector<16x32xf32>
      %cst_82 = arith.constant dense<0.000000e+00> : vector<32xf32>
      %299 = vector.multi_reduction <add>, %298, %cst_82 [0] : vector<16x32xf32> to vector<32xf32>
      %300 = vector.shape_cast %299 : vector<32xf32> to vector<1x32xf32>
      %cst_83 = arith.constant 1.600000e+01 : f32
      %301 = vector.broadcast %cst_83 : f32 to vector<1x32xf32>
      %302 = arith.divf %300, %301 : vector<1x32xf32>
      %303 = vector.extract_strided_slice %293 {offsets = [16, 0], sizes = [16, 32], strides = [1, 1]} : vector<32x32xf32> to vector<16x32xf32>
      %cst_84 = arith.constant dense<0.000000e+00> : vector<32xf32>
      %304 = vector.multi_reduction <add>, %303, %cst_84 [0] : vector<16x32xf32> to vector<32xf32>
      %305 = vector.shape_cast %304 : vector<32xf32> to vector<1x32xf32>
      %cst_85 = arith.constant 1.600000e+01 : f32
      %306 = vector.broadcast %cst_85 : f32 to vector<1x32xf32>
      %307 = arith.divf %305, %306 : vector<1x32xf32>
      %308 = tpu.concatenate %302, %307 in 0 : vector<1x32xf32>, vector<1x32xf32> -> vector<2x32xf32>
      %309 = arith.truncf %308 : vector<2x32xf32> to vector<2x32xbf16>
      %c0_86 = arith.constant 0 : index
      %c0_87 = arith.constant 0 : index
      %310 = vector.load %arg15[%c0_86, %c0_87] : memref<32x128xbf16, #tpu.memory_space<vmem>>, vector<32x128xbf16>
      %cst_88 = arith.constant dense<0.000000e+00> : vector<2x128xf32>
      %311 = tpu.matmul %309, %310, %cst_88 {dimension_numbers = #tpu.dot_dimension_numbers<[1], [0], [0], [1], [0, 0, 1, 1], [], []>} : vector<2x32xbf16>, vector<32x128xbf16>, vector<2x128xf32> -> vector<2x128xf32>
      %c0_89 = arith.constant 0 : index
      %c0_90 = arith.constant 0 : index
      %312 = vector.load %arg16[%c0_89, %c0_90] : memref<1x128xf32, #tpu.memory_space<vmem>>, vector<1x128xf32>
      %313 = vector.broadcast %312 : vector<1x128xf32> to vector<2x128xf32>
      %314 = arith.addf %311, %313 : vector<2x128xf32>
      %c0_91 = arith.constant 0 : index
      %c0_92 = arith.constant 0 : index
      %c0_93 = arith.constant 0 : index
      %315 = vector.load %arg17[%c0_91, %c0_92, %c0_93] : memref<1x2x128xf32, #tpu.memory_space<vmem>>, vector<1x2x128xf32>
      %316 = vector.shape_cast %315 : vector<1x2x128xf32> to vector<2x128xf32>
      %317 = vector.shape_cast %314 : vector<2x128xf32> to vector<1x2x128xf32>
      tpu.vector_store %arg17[%c0_91, %c0_92, %c0_93], %317 {strides = array<i32>} : memref<1x2x128xf32, #tpu.memory_space<vmem>>, vector<1x2x128xf32>,
    } else {
    }
    return
  }
  func.func @transform_0(%arg0: i32, %arg1: i32) -> (i32, i32, i32) {
    %c0_i32 = arith.constant 0 : i32
    %c0_i32_0 = arith.constant 0 : i32
    %c0_i32_1 = arith.constant 0 : i32
    return %arg0, %c0_i32, %c0_i32_0 : i32, i32, i32
  }
  func.func @transform_1(%arg0: i32, %arg1: i32) -> (i32, i32, i32) {
    %c0_i32 = arith.constant 0 : i32
    %c0_i32_0 = arith.constant 0 : i32
    %c0_i32_1 = arith.constant 0 : i32
    %c0_i32_2 = arith.constant 0 : i32
    return %c0_i32, %c0_i32_0, %c0_i32_1 : i32, i32, i32
  }
  func.func @transform_2(%arg0: i32, %arg1: i32) -> (i32, i32, i32) {
    %c0_i32 = arith.constant 0 : i32
    %c0_i32_0 = arith.constant 0 : i32
    %c0_i32_1 = arith.constant 0 : i32
    %c0_i32_2 = arith.constant 0 : i32
    return %c0_i32, %c0_i32_0, %c0_i32_1 : i32, i32, i32
  }
  func.func @transform_3(%arg0: i32, %arg1: i32) -> (i32, i32, i32) {
    %c0_i32 = arith.constant 0 : i32
    %c0_i32_0 = arith.constant 0 : i32
    %c0_i32_1 = arith.constant 0 : i32
    %c0_i32_2 = arith.constant 0 : i32
    return %c0_i32, %c0_i32_0, %c0_i32_1 : i32, i32, i32
  }
  func.func @transform_4(%arg0: i32, %arg1: i32) -> (i32, i32, i32) {
    %c0_i32 = arith.constant 0 : i32
    %c0_i32_0 = arith.constant 0 : i32
    %c0_i32_1 = arith.constant 0 : i32
    %c0_i32_2 = arith.constant 0 : i32
    return %c0_i32, %c0_i32_0, %c0_i32_1 : i32, i32, i32
  }
  func.func @transform_5(%arg0: i32, %arg1: i32) -> (i32, i32, i32) {
    %c0_i32 = arith.constant 0 : i32
    %c0_i32_0 = arith.constant 0 : i32
    %c0_i32_1 = arith.constant 0 : i32
    %c0_i32_2 = arith.constant 0 : i32
    return %c0_i32, %c0_i32_0, %c0_i32_1 : i32, i32, i32
  }
  func.func @transform_6(%arg0: i32, %arg1: i32) -> (i32, i32, i32) {
    %c0_i32 = arith.constant 0 : i32
    %c0_i32_0 = arith.constant 0 : i32
    %c0_i32_1 = arith.constant 0 : i32
    %c0_i32_2 = arith.constant 0 : i32
    return %c0_i32, %c0_i32_0, %c0_i32_1 : i32, i32, i32
  }
  func.func @transform_7(%arg0: i32, %arg1: i32) -> (i32, i32, i32) {
    %c0_i32 = arith.constant 0 : i32
    %c0_i32_0 = arith.constant 0 : i32
    %c0_i32_1 = arith.constant 0 : i32
    %c0_i32_2 = arith.constant 0 : i32
    return %c0_i32, %c0_i32_0, %c0_i32_1 : i32, i32, i32
  }
  func.func @transform_8(%arg0: i32, %arg1: i32) -> (i32, i32, i32) {
    %c0_i32 = arith.constant 0 : i32
    %c0_i32_0 = arith.constant 0 : i32
    %c0_i32_1 = arith.constant 0 : i32
    %c0_i32_2 = arith.constant 0 : i32
    return %c0_i32, %c0_i32_0, %c0_i32_1 : i32, i32, i32
  }
  func.func @transform_9(%arg0: i32, %arg1: i32) -> (i32, i32, i32) {
    %c0_i32 = arith.constant 0 : i32
    %c0_i32_0 = arith.constant 0 : i32
    %c0_i32_1 = arith.constant 0 : i32
    %c0_i32_2 = arith.constant 0 : i32
    return %c0_i32, %c0_i32_0, %c0_i32_1 : i32, i32, i32
  }
  func.func @transform_10(%arg0: i32, %arg1: i32) -> (i32, i32, i32) {
    %c0_i32 = arith.constant 0 : i32
    %c0_i32_0 = arith.constant 0 : i32
    %c0_i32_1 = arith.constant 0 : i32
    %c0_i32_2 = arith.constant 0 : i32
    return %c0_i32, %c0_i32_0, %c0_i32_1 : i32, i32, i32
  }
  func.func @transform_11(%arg0: i32, %arg1: i32) -> (i32, i32, i32) {
    %c0_i32 = arith.constant 0 : i32
    %c0_i32_0 = arith.constant 0 : i32
    %c0_i32_1 = arith.constant 0 : i32
    %c0_i32_2 = arith.constant 0 : i32
    return %c0_i32, %c0_i32_0, %c0_i32_1 : i32, i32, i32
  }
  func.func @transform_12(%arg0: i32, %arg1: i32) -> (i32, i32, i32) {
    %c0_i32 = arith.constant 0 : i32
    %c0_i32_0 = arith.constant 0 : i32
    %c0_i32_1 = arith.constant 0 : i32
    %c0_i32_2 = arith.constant 0 : i32
    return %c0_i32, %c0_i32_0, %c0_i32_1 : i32, i32, i32
  }
  func.func @transform_13(%arg0: i32, %arg1: i32) -> (i32, i32) {
    %c0_i32 = arith.constant 0 : i32
    %c0_i32_0 = arith.constant 0 : i32
    %c0_i32_1 = arith.constant 0 : i32
    return %c0_i32, %c0_i32_0 : i32, i32
  }
  func.func @transform_14(%arg0: i32, %arg1: i32) -> (i32, i32) {
    %c0_i32 = arith.constant 0 : i32
    %c0_i32_0 = arith.constant 0 : i32
    %c0_i32_1 = arith.constant 0 : i32
    return %c0_i32, %c0_i32_0 : i32, i32
  }
  func.func @transform_15(%arg0: i32, %arg1: i32) -> (i32, i32, i32) {
    %c0_i32 = arith.constant 0 : i32
    %c0_i32_0 = arith.constant 0 : i32
    %c0_i32_1 = arith.constant 0 : i32
    return %arg0, %c0_i32, %c0_i32_0 : i32, i32, i32
  }
}

</mosaic_0001>

<bundles_post_ra>
// kernel: transformer1d_forward.1
= control target key start
LH: loop header
LB: loop body
LE: loop exit
PB: predicated region body
PF: predicated region fallthrough
CT: control target
= control target key end

     0   :  { %s3413_s0 = inlined_call_operand.hbm [shape: f32[2,32,32], index: 0, kind: input, shape index: {}]   ;;  %s3414_s1 = inlined_call_operand.vmem [shape: bf16[6,32,96], index: 1, kind: input, shape index: {}]   ;;  %s3415_s2 = inlined_call_operand.hbm [shape: f32[6,1,96], index: 2, kind: input, shape index: {}]   ;;  %s3416_s3 = inlined_call_operand.vmem [shape: bf16[6,32,32], index: 3, kind: input, shape index: {}]   ;;  %s3417_s4 = inlined_call_operand.hbm [shape: f32[6,1,32], index: 4, kind: input, shape index: {}]   ;;  %s3418_s5 = inlined_call_operand.vmem [shape: f32[6,1,32], index: 5, kind: input, shape index: {}]   ;;  %s3419_s6 = inlined_call_operand.hbm [shape: f32[6,1,32], index: 6, kind: input, shape index: {}]   ;;  %s3420_s7 = inlined_call_operand.vmem [shape: bf16[6,32,64], index: 7, kind: input, shape index: {}]   ;;  %s3421_s8 = inlined_call_operand.hbm [shape: f32[6,1,64], index: 8, kind: input, shape index: {}]   ;;  %s3422_s9 = inlined_call_operand.vmem [shape: bf16[6,64,32], index: 9, kind: input, shape index: {}]   ;;  %s3423_s10 = inlined_call_operand.hbm [shape: f32[6,1,32], index: 10, kind: input, shape index: {}]   ;;  %s3424_s11 = inlined_call_operand.hbm [shape: f32[6,1,32], index: 11, kind: input, shape index: {}]   ;;  %s3425_s12 = inlined_call_operand.hbm [shape: f32[6,1,32], index: 12, kind: input, shape index: {}]   ;;  %s3426_s13 = inlined_call_operand.hbm [shape: bf16[32,128], index: 13, kind: input, shape index: {}]   ;;  %s3427_s14 = inlined_call_operand.vmem [shape: f32[1,128], index: 14, kind: input, shape index: {}]   ;;  %s3428_s15 = inlined_call_operand.vmem [shape: f32[2,2,128], index: 15, kind: output, shape index: {}]  }
   0x1   :  { %3431 = sst [smem:[#allocation23_spill]] %s3414_s1 }
   0x2   :  { %3432 = sst [smem:[#allocation24_spill]] %s3415_s2 }
   0x3   :  { %3433 = sst [smem:[#allocation25_spill]] %s3416_s3 }
   0x4   :  { %3434 = sst [smem:[#allocation26_spill]] %s3417_s4 }
   0x5   :  { %3435 = sst [smem:[#allocation27_spill]] %s3418_s5 }
   0x6   :  { %3436 = sst [smem:[#allocation28_spill]] %s3419_s6 }
   0x7   :  { %3437 = sst [smem:[#allocation29_spill]] %s3420_s7 }
   0x8   :  { %3438 = sst [smem:[#allocation30_spill]] %s3421_s8 }
   0x9   :  { %3439 = sst [smem:[#allocation31_spill]] %s3422_s9 }
   0xa   :  { %3440 = sst [smem:[#allocation32_spill]] %s3423_s10 }
   0xb   :  { %3441 = sst [smem:[#allocation33_spill]] %s3427_s14 }
   0xc   :  { %3442 = sst [smem:[#allocation34_spill]] %s3428_s15 }
   0xd   :  { %20 = vsyncpa [#allocation4], 0 }
   0xe   :  { %22 = vsyncpa [#allocation4 + $0x1], 0 }
   0xf   :  { %23 = vsyncpa [#allocation6], 0 }
  0x10   :  { %24 = vsyncpa [#allocation9], 0 }
  0x11   :  { %25 = vsyncpa [#allocation12], 0 }
  0x12   :  { %26 = vsyncpa [#allocation15], 0  ;;  %s2886_s18 = smov 0   ;;  %s2888_s19 = smov 0  }
  0x13   :  { %s2890_s20 = smov 0   ;;  %s2892_s21 = smov 0  }
  0x14   :  { %s2894_s22 = smov 0   ;;  %s2896_s23 = smov 0  }
  0x15   :  { %s2898_s24 = smov 0   ;;  %s2900_s25 = smov 0  }
  0x16 LB: > { %3443 = sst [smem:[#allocation22_spill]] %s2761_s21  ;;  %s2039_s26 = sadd.s32 4294967295, %s2777_s25   ;;  %s2777_s25 = sphi %s2900_s25, %s32_s25   ;;  %s2773_s24 = sphi %s2898_s24, %s3469_s24   ;;  %s2769_s23 = sphi %s2896_s23, %s3468_s23   ;;  %s2765_s22 = sphi %s2894_s22, %s3467_s22   ;;  %s2761_s21 = sphi %s2892_s21, %s3466_s21   ;;  %s2757_s20 = sphi %s2890_s20, %s3465_s20   ;;  %s2753_s19 = sphi %s2888_s19, %s3464_s19   ;;  %s2749_s18 = sphi %s2886_s18, %s3463_s18  }
  0x17   : > { %p2041_p0 = scmp.ge.s32.totalorder %s2777_s25, 1  ;;  %p2928_p1 = scmp.eq.s32.totalorder %s2039_s26, 0 }
  0x18   : > { %p395_p2 = scmp.lt.s32.totalorder %s2777_s25, 13  ;;  %s3445_s2 = sld [smem:[#allocation24_spill]] }
  0x19   : > { %s2779_s17 = smov [#allocation5]   ;;  %s3448_s6 = sld [smem:[#allocation28_spill]] }
  0x1a   : > { %p2936_p3 = pnand %p2041_p0, %p395_p2  ;;  %s411_s14 = sshll.u32 %s2779_s17, 4  ;;  %s412_s14 = int_to_ptr.vmem [resolvable:$true] %s411_s14 }
  0x1b   : > { %s2780_s29 = smov 16   ;;  %s2782_s17 = smov [#allocation8]  }
  0x1c   : > { %p2195_p4 = pneg %p2936_p3  ;;  %s445_s5 = sshll.u32 %s2782_s17, 4  ;;  %s446_s5 = int_to_ptr.vmem [resolvable:$true] %s445_s5 }
  0x1d   : > { %s3449_s10 = sld [smem:[#allocation32_spill]]  ;;  %s2783_s15 = smov [#allocation11]  }
  0x1e   : > { %s409_s30 = sshll.u32 %s3445_s2, 4  ;;  %p2944_p5 = pnand %p2195_p4, %p2928_p1  ;;  %s410_s30 = int_to_ptr.hbm [resolvable:$true] %s409_s30 }
  0x1f   : > { %s443_s28 = sshll.u32 %s3448_s6, 4  ;;  %s2781_s2 = smov 1   ;;  %s444_s28 = int_to_ptr.hbm [resolvable:$true] %s443_s28 }
  0x20   : > { %2198 = dma.hbm_to_vmem [thread:$0]  (!%p2944_p5), %s410_s30, 96, %s412_s14, [#allocation6], %s2780_s29, %s2780_s29, %s2781_s2  }
  0x21   : > { %2204 = dma.hbm_to_vmem [thread:$0]  (!%p2944_p5), %s444_s28, 96, %s446_s5, [#allocation9], %s2780_s29, %s2780_s29, %s2781_s2  }
  0x22   : > { %s505_s6 = sshll.u32 %s3425_s12, 4  ;;  %s479_s14 = sshll.u32 %s2783_s15, 4  ;;  %s506_s6 = int_to_ptr.hbm [resolvable:$true] %s505_s6  ;;  %s480_s14 = int_to_ptr.vmem [resolvable:$true] %s479_s14 }
  0x23   : > { %s477_s21 = sshll.u32 %s3449_s10, 4  ;;  %s2784_s1 = smov [#allocation14]   ;;  %s478_s21 = int_to_ptr.hbm [resolvable:$true] %s477_s21 }
  0x24   : > { %2210 = dma.hbm_to_vmem [thread:$0]  (!%p2944_p5), %s478_s21, 96, %s480_s14, [#allocation12], %s2780_s29, %s2780_s29, %s2781_s2  }
  0x25   : > { %s507_s3 = sshll.u32 %s2784_s1, 4  ;;  %s3450_s4 = sld [smem:[#allocation26_spill]]  ;;  %s508_s3 = int_to_ptr.vmem [resolvable:$true] %s507_s3 }
  0x26   : > { %2216 = dma.hbm_to_vmem [thread:$0]  (!%p2944_p5), %s506_s6, 96, %s508_s3, [#allocation15], %s2780_s29, %s2780_s29, %s2781_s2  }
  0x27   : > { %s3451_s8 = sld [smem:[#allocation30_spill]]  ;;  %s2785_s9 = smov [#allocation7]  }
  0x28   : > { %s428_s21 = sshll.u32 %s2785_s9, 4  ;;  %s2786_s14 = smov [#allocation10]   ;;  %s429_s21 = int_to_ptr.vmem [resolvable:$true] %s428_s21 }
  0x29   : > { %s462_s1 = sshll.u32 %s2786_s14, 4  ;;  %s491_s6 = sshll.u32 %s3424_s11, 4  ;;  %s463_s1 = int_to_ptr.vmem [resolvable:$true] %s462_s1  ;;  %s492_s6 = int_to_ptr.hbm [resolvable:$true] %s491_s6 }
  0x2a   : > { %s2787_s28 = smov [#allocation13]   ;;  %s2789_s14 = smov 64  }
  0x2b   : > { %s426_s5 = sshll.u32 %s3450_s4, 4  ;;  %s493_s9 = sshll.u32 %s2787_s28, 4  ;;  %s427_s5 = int_to_ptr.hbm [resolvable:$true] %s426_s5  ;;  %s494_s9 = int_to_ptr.vmem [resolvable:$true] %s493_s9 }
  0x2c   : > { %2201 = dma.hbm_to_vmem [thread:$0]  (!%p2944_p5), %s427_s5, 96, %s429_s21, [#allocation6], %s2780_s29, %s2780_s29, %s2781_s2  }
  0x2d   : > { %s460_s7 = sshll.u32 %s3451_s8, 4  ;;  %s519_s5 = sshll.u32 %s3426_s13, 4  ;;  %s461_s7 = int_to_ptr.hbm [resolvable:$true] %s460_s7  ;;  %s520_s5 = int_to_ptr.hbm [resolvable:$true] %s519_s5 }
  0x2e   : > { %2207 = dma.hbm_to_vmem [thread:$0]  (!%p2944_p5), %s461_s7, 96, %s463_s1, [#allocation9], %s2780_s29, %s2780_s29, %s2781_s2  }
  0x2f   : > { %2213 = dma.hbm_to_vmem [thread:$0]  (!%p2944_p5), %s492_s6, 96, %s494_s9, [#allocation12], %s2780_s29, %s2780_s29, %s2781_s2  }
  0x30   : > { %s2788_s7 = smov [#allocation16]   ;;  %s2790_s1 = smov 4  }
  0x31   : > { %s521_s21 = sshll.u32 %s2788_s7, 4  ;;  %s41_s30 = sadd.s32 1, %s2769_s23  ;;  %s522_s21 = int_to_ptr.vmem [resolvable:$true] %s521_s21 }
  0x32   : > { %2219 = dma.hbm_to_vmem [thread:$0]  (!%p2944_p5), %s520_s5, 256, %s522_s21, [#allocation15], %s2789_s14, %s2789_s14, %s2790_s1  }
  0x33   : > { %s44_s17 = sadd.s32 1, %s2773_s24  ;;  %p42_p6 = scmp.ge.s32.totalorder %s41_s30, 6 }
  0x34   : > { %s51_s3 = sadd.s32 1, %s2757_s20  ;;  %p58_p7 = scmp.ne.s32.totalorder %s2757_s20, %s2753_s19 }
  0x35   : > { %p59_p8 = scmp.eq.s32.totalorder %s2777_s25, 0  ;;  %s3471_s30 = smov (%p42_p6, %s41_s30), 0 }
  0x36   : > { %s3473_s17 = smov (!%p42_p6, %s44_s17), %s2773_s24  ;;  %p64_p10 = scmp.ne.s32.totalorder %s2753_s19, %s2749_s18 }
  0x37   : > { %p3015_p9 = por %p59_p8, %p58_p7  ;;  %p46_p11 = scmp.ge.s32.totalorder %s3473_s17, 2 }
  0x38   : > { %p2232_p12 = scmp.lt.s32.totalorder %s2777_s25, 12  ;;  %p3024_p13 = por %p2928_p1, %p64_p10 }
  0x39   : > { %s538_s29 = sand.u32 1, %s2757_s20   ;;  %s3475_s17 = smov (%p46_p11, %s3473_s17), 0 }
  0x3a   : > { %s2051_s6 = sshll.u32 %s538_s29, 5  ;;  %s48_s15 = ssub.s32 %s2773_s24, %s3475_s17 }
  0x3b   : > { %p49_p0 = scmp.eq.s32.totalorder %s48_s15, 0  ;;  %s2146_s5 = sshll.u32 %s2773_s24, 5 }
  0x3c   : > { %s547_s18 = scalar_lea.hbm %s3413_s0, %s2146_s5  ;;  %s542_s7 = scalar_lea.vmem [#allocation3], %s2051_s6 }
  0x3d   : > { %s550_s21 = sshll.u32 %s542_s7, 4  ;;  %s548_s1 = sshll.u32 %s547_s18, 4  ;;  %s551_s21 = int_to_ptr.vmem [resolvable:$true] %s550_s21  ;;  %s549_s1 = int_to_ptr.hbm [resolvable:$true] %s548_s1 }
  0x3e   : > { %s3038_s14 = scalar_select %p49_p0, %s2757_s20, %s51_s3  }
  0x3f   : > { %p2221_p2 = pnand %p2232_p12, %p3015_p9  ;;  %s539_s4 = scalar_lea.sflag [#allocation4], %s538_s29 }
  0x40   : > { %s2791_s8 = smov 128   ;;  %s2792_s10 = smov 8  }
  0x41   : > { %2223 = dma.hbm_to_vmem [thread:$0]  (!%p2221_p2), %s549_s1, 512, %s551_s21, %s539_s4, %s2791_s8, %s2791_s8, %s2792_s10  }
  0x42   : > { %562 = sbr.rel (%p2936_p3) target bundleno = 3251 (0xcb3), region = 80  ;;  %s564_s15 = sand.u32 (!%p2936_p3), 1, %s2753_s19  }
  0x43   : > { %s2055_s6 = sshll.u32 (!%p2936_p3), %s564_s15, 5  ;;  %s565_s5 = scalar_lea.sflag (!%p2936_p3), [#allocation4], %s564_s15 }
  0x44   : > { %s568_s3 = scalar_lea.vmem (!%p2936_p3), [#allocation3], %s2055_s6 }
  0x47   : > { %2728 = dma.done.wait (%p3024_p13), %s565_s5, 512  }
  0x48   : > { %2730 = vsyncadd (%p3024_p13), %s565_s5, 4294966784 }
  0x49   : > { %2732 = dma.done.wait (%p2928_p1), [#allocation6], 192  }
  0x4a   : > { %2734 = vsyncadd (%p2928_p1), [#allocation6], 4294967104 }
  0x4b   : > { %2736 = dma.done.wait (%p2928_p1), [#allocation9], 192  }
  0x4c   : > { %2738 = vsyncadd (%p2928_p1), [#allocation9], 4294967104 }
  0x4d   : > { %2740 = dma.done.wait (%p2928_p1), [#allocation12], 192  }
  0x4e   : > { %2742 = vsyncadd (%p2928_p1), [#allocation12], 4294967104 }
  0x4f   : > { %2744 = dma.done.wait (%p2928_p1), [#allocation15], 352  }
  0x50   : > { %2746 = vsyncadd (%p2928_p1), [#allocation15], 4294966944  ;;  %p655_p3 = scmp.lt.s32.totalorder %s2765_s22, 1  ;;  %s3454_s16 = sld [smem:[#allocation34_spill]] }
  0x51   : > { %s3455_s26 = sld [smem:[#allocation22_spill]] }
  0x52   : > { %s3477_s22 = smov (!%p655_p3, %s2765_s22), 1 }
  0x53   : > { %s2064_s4 = sshll.u32 %s3477_s22, 1 }
  0x56   : > { %s3072_s2 = scalar_lea.vmem %s3454_s16, %s2064_s4 }
  0x57   : > { %p2065_p4 = scmp.ne.s32.totalorder %s3455_s26, 0 }
  0x59   : > { %663 = sbr.rel (%p2065_p4) target bundleno = 99 (0x63), region = 120 }
  0x5e   : > { %v664_v0 = vld [vmem:[%s568_s3] sm:$0xff]  ;;  %vm668_vm0 = vcmask 261120   ;;  %v665_v1 = vld [vmem:[%s568_s3 + $0x8] sm:$0xff]  ;;  %v666_v2 = vld [vmem:[%s568_s3 + $0x10] sm:$0xff] }
  0x5f   : > { %669 = vst.msk [vmem:[#allocation2] sm:$0xff] %vm668_vm0, %v664_v0  ;;  %v667_v3 = vld [vmem:[%s568_s3 + $0x18] sm:$0xff] }
  0x60   : > { %670 = vst.msk [vmem:[#allocation2 + $0x8] sm:$0xff] %vm668_vm0, %v665_v1 }
  0x61   : > { %671 = vst.msk [vmem:[#allocation2 + $0x10] sm:$0xff] %vm668_vm0, %v666_v2 }
  0x62   : > { %672 = vst.msk [vmem:[#allocation2 + $0x18] sm:$0xff] %vm668_vm0, %v667_v3 }
  0x63 PF: > { %s3456_s27 = sld [smem:[#allocation22_spill]]  ;;  %vm740_vm1 = vcmask 261120   ;;  %s2793_s21 = smov 120   ;;  %vm770_vm2 = vcmask 64512   ;;  %vm791_vm3 = vcmask 130048   ;;  %vm907_vm4 = vcmask 1043456  }
  0x64   : > { %s3457_s9 = sld [smem:[#allocation23_spill]]  ;;  %s2794_s1 = smov 96  }
  0x65   : > { %s2795_s15 = smov 88   ;;  %s2796_s6 = smov 56  }
  0x66   : > { %v3083_v6 = vld [vmem:[#allocation2] sm:$0xff]  ;;  %s2797_s5 = smov 64   ;;  %s2798_s3 = smov 80  }
  0x67   : > { %v3085_v7 = vld [vmem:[#allocation2 + $0x8] sm:$0xff]  ;;  %s2799_s4 = smov 48   ;;  %s3458_s16 = sld [smem:[#allocation25_spill]] }
  0x68   : > { %v723_v8 = vpack.c.bf16 %v3085_v7, %v3083_v6  ;;  %s2800_s29 = smov 112   ;;  %s2801_s28 = smov 72  }
  0x69   : > { %s3076_s22 = sshll.u32 %s3456_s27, 4  ;;  %s680_s7 = scalar_lea.vmem [#allocation5], %s3456_s27 }
  0x6a   : > { %s675_s18 = scalar_lea.vmem %s3457_s9, %s3076_s22  ;;  %v3090_v10 = vld [vmem:[%s680_s7] ss:$0 sm:$0xff]  ;;  %s2802_s9 = smov 104  }
  0x6b   : > { %v2149_v4 = vld [vmem:[%s675_s18 + $0x8] sm:$0xff]  ;;  %v2148_v5 = vld [vmem:[%s675_s18] sm:$0xff]  ;;  %s2803_s18 = smov 40   ;;  %s688_s7 = scalar_lea.vmem [#allocation7], %s3456_s27 }
  0x6c   : > { %753 = vmatpush.bf16.msra.mxu0 %v2149_v4  ;;  %v3141_v4 = vld [vmem:[#allocation2 + $0x10] sm:$0xff]  ;;  %s3460_s8 = sld [smem:[#allocation29_spill]]  ;;  %p2134_p1 = scmp.ne.s32.totalorder %s3456_s27, 5 }
  0x6d   : > { %s3125_s26 = scalar_lea.vmem %s3458_s16, %s3076_s22 }
  0x6e   : > { %v685_v44 = vld [vmem:[%s3125_s26 + $0x4] sm:$0xf] }
  0x6f   : > { %v3129_v45 = vsel %vm907_vm4, %v685_v44, 0 }
  0x70   : > { %754 = vmatpush.bf16.msra.mxu0 %v2148_v5  ;;  %v3143_v5 = vld [vmem:[#allocation2 + $0x18] sm:$0xff] }
  0x72   : > { %s695_s10 = scalar_lea.vmem %s3460_s8, %s3076_s22 }
  0x73   : > { %2080 = vmatmul.msk.bf16.vlgmr.msra.gmra.mxu0 %vm740_vm1, %v723_v8  ;;  %v724_v8 = vpack.c.bf16 %v3143_v5, %v3141_v4 }
  0x83   : > { %2081 = vmatmul.msk.bf16.gmra.mxu0 %vm740_vm1, %v724_v8 }
  0xf0   : > { %v756_v9 = vpop.f32.mrf.mxu0 }
  0xf1   : > { %v757_v12 = vadd.f32 %v3090_v10, %v756_v9 }
  0xf8   : > { %v758_v11 = vpop.f32.mrf.mxu0 }
  0xf9   : > { %v759_v13 = vadd.f32 %v3090_v10, %v758_v11 }
  0xfb   : > { %v3094_v14 = vpack.c.bf16 %v759_v13, %v757_v12 }
  0xfd   : > { %836 = vrot.lane.b32.xlu1 %v3094_v14, %s2793_s21  ;;  %768 = vrot.lane.b32.xlu0 %v3094_v14, %s2794_s1 }
 0x105   : > { %838 = vrot.lane.b32.xlu0 %v3094_v14, %s2795_s15 }
 0x16f   : > { %v769_v15 = vpop.permute.xlu0 %768  ;;  %v837_v19 = vpop.permute.xlu1 %836 }
 0x170   : > { %v775_v16 = vsel %vm770_vm2, %v769_v15, 0 }
 0x171   : > { %784 = vmatpush.bf16.xpose.msra.mxu1 %v775_v16 }
 0x177   : > { %v839_v17 = vpop.permute.xlu0 %838 }
 0x178   : > { %2082 = vmatmul.msk.bf16.vlgmr.msra.gmra.mxu1 %vm770_vm2, %v3094_v14  ;;  %v844_v18 = vsel %vm770_vm2, %v839_v17, 0 }
 0x179   : > { %853 = vmatpush.bf16.xpose.msra.mxu3 %v844_v18 }
 0x180   : > { %2084 = vmatmul.msk.bf16.vlgmr.msra.gmra.mxu3 %vm770_vm2, %v837_v19  ;;  %v684_v19 = vld [vmem:[%s3125_s26] sm:$0xf] }
 0x1f5   : > { %v786_v20 = vpop.f32.mrf.mxu1 }
 0x1f6   : > { %v792_v21 = vsel %vm791_vm3, %v786_v20, -inf }
 0x1f7   : > { %793 = vmax.xlane.f32.xlu1 %v792_v21  ;;  %v3156_v21 = vsel %vm907_vm4, %v684_v19, 0 }
 0x1f8   : > { %938 = vmatpush.bf16.msrb.mxu3 %v3156_v21 }
 0x1fd   : > { %v788_v22 = vpop.f32.mrf.mxu1 }
 0x1fe   : > { %v795_v23 = vsel %vm791_vm3, %v788_v22, -inf }
 0x1ff   : > { %796 = vmax.xlane.f32.xlu2 %v795_v23 }
 0x203   : > { %v855_v24 = vpop.f32.mrf.mxu3 }
 0x204   : > { %v860_v25 = vsel %vm791_vm3, %v855_v24, -inf }
 0x205   : > { %861 = vmax.xlane.f32.xlu0 %v860_v25 }
 0x20b   : > { %v857_v26 = vpop.f32.mrf.mxu3 }
 0x20c   : > { %v863_v27 = vsel %vm791_vm3, %v857_v26, -inf }
 0x210   : > { %879 = vrot.lane.b32.xlu1 %v3094_v14, %s2796_s6 }
 0x217   : > { %811 = vrot.lane.b32.xlu2 %v3094_v14, %s2797_s5 }
 0x240   : > { %864 = vmax.xlane.f32.xlu2 %v863_v27 }
 0x258   : > { %947 = vrot.lane.b32.xlu2 %v3094_v14, %s2798_s3 }
 0x260   : > { %988 = vrot.lane.b32.xlu2 %v3094_v14, %s2799_s4 }
 0x26a   : > { %v794_v28 = vpop.xlane.xlu1 %793 }
 0x26b   : > { %v798_v29 = vsub.f32 %v786_v20, %v794_v28 }
 0x26d   : > { %v800_v30 = vmul.f32 1.442695, %v798_v29 }
 0x26f   : > { %2340 = vpow2.f32 %v800_v30 }
 0x272   : > { %v797_v31 = vpop.xlane.xlu2 %796 }
 0x273   : > { %v799_v32 = vsub.f32 %v788_v22, %v797_v31 }
 0x275   : > { %v802_v33 = vmul.f32 1.442695, %v799_v32  ;;  %v2341_v38 = vpop.eup %2340 }
 0x276   : > { %v804_v16 = vsel %vm791_vm3, %v2341_v38, 0.0 }
 0x277   : > { %2342 = vpow2.f32 %v802_v33  ;;  %v761_v33 = vpop.f32.mrf.mxu0 }
 0x278   : > { %v862_v34 = vpop.xlane.xlu0 %861 }
 0x279   : > { %v866_v35 = vsub.f32 %v855_v24, %v862_v34 }
 0x27a   : > { %v812_v36 = vpop.permute.xlu2 %811 }
 0x27b   : > { %v868_v37 = vmul.f32 1.442695, %v866_v35  ;;  %824 = vmatpush.bf16.msra.mxu2 %v812_v36 }
 0x27d   : > { %v2343_v39 = vpop.eup %2342  ;;  %2344 = vpow2.f32 %v868_v37 }
 0x27e   : > { %v810_v40 = vpack.c.bf16 %v2343_v39, %v2341_v38  ;;  %v807_v17 = vsel %vm791_vm3, %v2343_v39, 0.0 }
 0x27f   : > { %v763_v39 = vpop.f32.mrf.mxu0 }
 0x280   : > { %2083 = vmatmul.msk.bf16.vlgmr.msra.gmra.mxu2 %vm791_vm3, %v810_v40  ;;  %v762_v40 = vadd.f32 %v3090_v10, %v761_v33 }
 0x282   : > { %v880_v41 = vpop.permute.xlu1 %879 }
 0x283   : > { %v2345_v42 = vpop.eup %2344  ;;  %892 = vmatpush.bf16.msrb.mxu2 %v880_v41  ;;  %v764_v41 = vadd.f32 %v3090_v10, %v763_v39 }
 0x284   : > { %v872_v43 = vsel %vm791_vm3, %v2345_v42, 0.0 }
 0x285   : > { %873 = vadd.xlane.f32.xlu0 %v872_v43  ;;  %v686_v43 = vld [vmem:[%s3125_s26 + $0x8] sm:$0xf] }
 0x286   : > { %v1017_v44 = vsel %vm907_vm4, %v686_v43, 0 }
 0x287   : > { %918 = vmatpush.bf16.msra.mxu2 %v3129_v45  ;;  %1026 = vmatpush.bf16.msrb.mxu1 %v1017_v44 }
 0x2b3   : > { %v865_v46 = vpop.xlane.xlu2 %864 }
 0x2b4   : > { %v867_v47 = vsub.f32 %v857_v26, %v865_v46 }
 0x2b6   : > { %v870_v48 = vmul.f32 1.442695, %v867_v47 }
 0x2b8   : > { %2346 = vpow2.f32 %v870_v48 }
 0x2bb   : > { %v948_v49 = vpop.permute.xlu2 %947 }
 0x2bc   : > { %v953_v53 = vsel %vm770_vm2, %v948_v49, 0 }
 0x2be   : > { %v2347_v50 = vpop.eup %2346 }
 0x2bf   : > { %v875_v51 = vsel %vm791_vm3, %v2347_v50, 0.0  ;;  %v878_v52 = vpack.c.bf16 %v2347_v50, %v2345_v42  ;;  %v3167_v42 = vpack.c.bf16 %v764_v41, %v762_v40 }
 0x2c0   : > { %876 = vadd.xlane.f32.xlu0 %v875_v51 }
 0x2c1   : > { %2085 = vmatmul.msk.bf16.vlgmr.msrb.gmra.mxu2 %vm791_vm3, %v878_v52 }
 0x2c2   : > { %962 = vmatpush.bf16.xpose.msrb.mxu2 %v953_v53 }
 0x2c3   : > { %v989_v54 = vpop.permute.xlu2 %988 }
 0x2c4   : > { %1001 = vmatpush.bf16.msrb.mxu0 %v989_v54 }
 0x2d4   : > { %945 = vrot.lane.b32.xlu0 %v3094_v14, %s2800_s29 }
 0x2f8   : > { %v874_v56 = vpop.xlane.xlu0 %873 }
 0x2f9   : > { %2348 = vrcp.f32 %v874_v56 }
 0x2ff   : > { %v2349_v60 = vpop.eup %2348 }
 0x303   : > { %v826_v55 = vpop.f32.mrf.mxu2 }
 0x30b   : > { %v828_v57 = vpop.f32.mrf.mxu2 }
 0x333   : > { %v877_v58 = vpop.xlane.xlu0 %876 }
 0x334   : > { %2350 = vrcp.f32 %v877_v58 }
 0x33a   : > { %v2351_v61 = vpop.eup %2350 }
 0x344   : > { %v894_v59 = vpop.f32.mrf.mxu2 }
 0x345   : > { %v901_v63 = vmul.f32 %v2349_v60, %v894_v59 }
 0x346   : > { %v946_v2 = vpop.permute.xlu0 %945 }
 0x34c   : > { %v896_v62 = vpop.f32.mrf.mxu2 }
 0x34d   : > { %v902_v0 = vmul.f32 %v2351_v61, %v896_v62 }
 0x34f   : > { %v903_v1 = vpack.c.bf16 %v902_v0, %v901_v63 }
 0x351   : > { %2086 = vmatmul.msk.bf16.vlgmr.msra.gmra.mxu2 %vm770_vm2, %v903_v1 }
 0x361   : > { %2088 = vmatmul.msk.bf16.vlgmr.msrb.gmra.mxu2 %vm770_vm2, %v946_v2 }
 0x3d4   : > { %v3139_v3 = vpop.f32.mrf.mxu2 }
 0x3dc   : > { %v3148_v9 = vpop.f32.mrf.mxu2 }
 0x3e4   : > { %v964_v11 = vpop.f32.mrf.mxu2 }
 0x3e5   : > { %v969_v12 = vsel %vm791_vm3, %v964_v11, -inf }
 0x3e6   : > { %970 = vmax.xlane.f32.xlu1 %v969_v12 }
 0x3ec   : > { %v966_v13 = vpop.f32.mrf.mxu2 }
 0x3ed   : > { %v972_v15 = vsel %vm791_vm3, %v966_v13, -inf }
 0x3ee   : > { %973 = vmax.xlane.f32.xlu0 %v972_v15 }
 0x3f6   : > { %805 = vadd.xlane.f32.xlu0 %v804_v16 }
 0x3fe   : > { %808 = vadd.xlane.f32.xlu0 %v807_v17 }
 0x459   : > { %v971_v18 = vpop.xlane.xlu1 %970 }
 0x45a   : > { %v975_v20 = vsub.f32 %v964_v11, %v971_v18 }
 0x45c   : > { %v977_v22 = vmul.f32 1.442695, %v975_v20 }
 0x45e   : > { %2352 = vpow2.f32 %v977_v22 }
 0x461   : > { %v974_v23 = vpop.xlane.xlu0 %973 }
 0x462   : > { %v976_v24 = vsub.f32 %v966_v13, %v974_v23 }
 0x464   : > { %v2353_v25 = vpop.eup %2352  ;;  %v979_v26 = vmul.f32 1.442695, %v976_v24 }
 0x465   : > { %v981_v27 = vsel %vm791_vm3, %v2353_v25, 0.0 }
 0x466   : > { %2354 = vpow2.f32 %v979_v26  ;;  %982 = vadd.xlane.f32.xlu2 %v981_v27 }
 0x469   : > { %v806_v28 = vpop.xlane.xlu0 %805 }
 0x46a   : > { %2356 = vrcp.f32 %v806_v28 }
 0x46c   : > { %v2355_v29 = vpop.eup %2354 }
 0x46d   : > { %v984_v30 = vsel %vm791_vm3, %v2355_v29, 0.0  ;;  %v987_v31 = vpack.c.bf16 %v2355_v29, %v2353_v25 }
 0x46e   : > { %985 = vadd.xlane.f32.xlu1 %v984_v30 }
 0x46f   : > { %2089 = vmatmul.msk.bf16.vlgmr.msrb.gmra.mxu0 %vm791_vm3, %v987_v31 }
 0x470   : > { %v2357_v34 = vpop.eup %2356 }
 0x471   : > { %v809_v32 = vpop.xlane.xlu0 %808  ;;  %v833_v36 = vmul.f32 %v2357_v34, %v826_v55 }
 0x472   : > { %2358 = vrcp.f32 %v809_v32 }
 0x478   : > { %v2359_v35 = vpop.eup %2358 }
 0x479   : > { %v834_v37 = vmul.f32 %v2359_v35, %v828_v57 }
 0x47b   : > { %v835_v38 = vpack.c.bf16 %v834_v37, %v833_v36 }
 0x47d   : > { %2087 = vmatmul.msk.bf16.vlgmr.msrb.gmra.mxu3 %vm770_vm2, %v835_v38 }
 0x47e   : > { %1037 = vrot.lane.b32.xlu2 %v3094_v14, %s2801_s28 }
 0x487   : > { %1127 = vrot.lane.b32.xlu1 %v3167_v42, %s2794_s1  ;;  %s715_s1 = scalar_lea.vmem [#allocation13], %s3456_s27 }
 0x48f   : > { %1035 = vrot.lane.b32.xlu1 %v3094_v14, %s2802_s9 }
 0x4d9   : > { %v983_v46 = vpop.xlane.xlu2 %982 }
 0x4da   : > { %2360 = vrcp.f32 %v983_v46 }
 0x4e0   : > { %v2361_v50 = vpop.eup %2360 }
 0x4e1   : > { %v1038_v47 = vpop.permute.xlu2 %1037  ;;  %v986_v49 = vpop.xlane.xlu1 %985 }
 0x4e2   : > { %v1043_v48 = vsel %vm770_vm2, %v1038_v47, 0  ;;  %2362 = vrcp.f32 %v986_v49 }
 0x4e3   : > { %1052 = vmatpush.bf16.xpose.msra.mxu3 %v1043_v48 }
 0x4e8   : > { %v2363_v51 = vpop.eup %2362 }
 0x4ec   : > { %v1003_v10 = vpop.f32.mrf.mxu0 }
 0x4ed   : > { %v1010_v53 = vmul.f32 %v2361_v50, %v1003_v10 }
 0x4f4   : > { %v1005_v52 = vpop.f32.mrf.mxu0 }
 0x4f5   : > { %v1011_v54 = vmul.f32 %v2363_v51, %v1005_v52 }
 0x4f7   : > { %v1012_v55 = vpack.c.bf16 %v1011_v54, %v1010_v53 }
 0x4f9   : > { %v1128_v56 = vpop.permute.xlu1 %1127  ;;  %2090 = vmatmul.msk.bf16.vlgmr.msrb.gmra.mxu1 %vm770_vm2, %v1012_v55 }
 0x4fa   : > { %v1133_v57 = vsel %vm770_vm2, %v1128_v56, 0  ;;  %v687_v56 = vld [vmem:[%s3125_s26 + $0xc] sm:$0xf]  ;;  %s700_s26 = scalar_lea.vmem [#allocation10], %s3456_s27 }
 0x4fb   : > { %1142 = vmatpush.bf16.xpose.msra.mxu1 %v1133_v57  ;;  %v1107_v57 = vsel %vm907_vm4, %v687_v56, 0 }
 0x4fc   : > { %1116 = vmatpush.bf16.msra.mxu0 %v1107_v57 }
 0x500   : > { %v940_v59 = vpop.f32.mrf.mxu3 }
 0x501   : > { %v1036_v58 = vpop.permute.xlu1 %1035  ;;  %v941_v60 = vadd.f32 %v940_v59, %v3139_v3 }
 0x502   : > { %2091 = vmatmul.msk.bf16.vlgmr.msra.gmra.mxu3 %vm770_vm2, %v1036_v58 }
 0x503   : > { %1271 = vmatpush.bf16.msrb.mxu1 %v3129_v45 }
 0x508   : > { %v3185_v63 = vpop.f32.mrf.mxu3 }
 0x509   : > { %2094 = vmatmul.msk.bf16.vlgmr.msra.gmra.mxu1 %vm770_vm2, %v3167_v42 }
 0x50a   : > { %1373 = vmatpush.bf16.msra.mxu1 %v1017_v44 }
 0x576   : > { %v1028_v61 = vpop.f32.mrf.mxu1 }
 0x577   : > { %v3183_v62 = vadd.f32 %v1028_v61, %v941_v60 }
 0x57e   : > { %v3187_v0 = vpop.f32.mrf.mxu1 }
 0x585   : > { %v1054_v1 = vpop.f32.mrf.mxu3 }
 0x586   : > { %v1144_v2 = vpop.f32.mrf.mxu1  ;;  %v1059_v45 = vsel %vm791_vm3, %v1054_v1, -inf }
 0x587   : > { %1060 = vmax.xlane.f32.xlu2 %v1059_v45  ;;  %v1149_v8 = vsel %vm791_vm3, %v1144_v2, -inf }
 0x588   : > { %1150 = vmax.xlane.f32.xlu0 %v1149_v8 }
 0x58d   : > { %v1056_v3 = vpop.f32.mrf.mxu3 }
 0x58e   : > { %v1146_v11 = vpop.f32.mrf.mxu1  ;;  %v1062_v13 = vsel %vm791_vm3, %v1056_v3, -inf }
 0x58f   : > { %v1152_v12 = vsel %vm791_vm3, %v1146_v11, -inf }
 0x590   : > { %1153 = vmax.xlane.f32.xlu1 %v1152_v12 }
 0x59c   : > { %1168 = vrot.lane.b32.xlu0 %v3167_v42, %s2797_s5  ;;  %s692_s5 = scalar_lea.vmem [#allocation8], %s3456_s27 }
 0x5a9   : > { %1078 = vrot.lane.b32.xlu1 %v3094_v14, %s2803_s18 }
 0x5b1   : > { %1193 = vrot.lane.b32.xlu1 %v3167_v42, %s2793_s21  ;;  %s713_s21 = scalar_lea.vmem [#allocation11], %s3456_s27 }
 0x5b9   : > { %1297 = vrot.lane.b32.xlu1 %v3167_v42, %s2798_s3  ;;  %s3462_s3 = sld [smem:[#allocation33_spill]] (!%p2134_p1) }
 0x5c1   : > { %1382 = vrot.lane.b32.xlu1 %v3167_v42, %s2802_s9 }
 0x5c6   : > { %1063 = vmax.xlane.f32.xlu0 %v1062_v13 }
 0x5da   : > { %1195 = vrot.lane.b32.xlu0 %v3167_v42, %s2795_s15  ;;  %s3459_s15 = sld [smem:[#allocation27_spill]] }
 0x5e2   : > { %1295 = vrot.lane.b32.xlu0 %v3167_v42, %s2800_s29  ;;  %s2154_s29 = sshll.u32 %s3456_s27, 5 }
 0x5fa   : > { %v1061_v14 = vpop.xlane.xlu2 %1060 }
 0x5fb   : > { %v1065_v15 = vsub.f32 %v1054_v1, %v1061_v14  ;;  %v1151_v16 = vpop.xlane.xlu0 %1150 }
 0x5fc   : > { %v1155_v17 = vsub.f32 %v1144_v2, %v1151_v16 }
 0x5fd   : > { %v1067_v18 = vmul.f32 1.442695, %v1065_v15 }
 0x5fe   : > { %v1157_v19 = vmul.f32 1.442695, %v1155_v17 }
 0x5ff   : > { %2364 = vpow2.f32 %v1067_v18 }
 0x600   : > { %2366 = vpow2.f32 %v1157_v19 }
 0x603   : > { %v1154_v20 = vpop.xlane.xlu1 %1153 }
 0x604   : > { %v1156_v22 = vsub.f32 %v1146_v11, %v1154_v20 }
 0x605   : > { %v2365_v23 = vpop.eup %2364 }
 0x606   : > { %v2367_v24 = vpop.eup %2366  ;;  %v1159_v25 = vmul.f32 1.442695, %v1156_v22  ;;  %v1071_v26 = vsel %vm791_vm3, %v2365_v23, 0.0 }
 0x607   : > { %1072 = vadd.xlane.f32.xlu1 %v1071_v26  ;;  %v1161_v27 = vsel %vm791_vm3, %v2367_v24, 0.0 }
 0x608   : > { %2368 = vpow2.f32 %v1159_v25  ;;  %1162 = vadd.xlane.f32.xlu2 %v1161_v27 }
 0x60e   : > { %v2369_v28 = vpop.eup %2368  ;;  %v1169_v29 = vpop.permute.xlu0 %1168 }
 0x60f   : > { %v1167_v30 = vpack.c.bf16 %v2369_v28, %v2367_v24  ;;  %1181 = vmatpush.bf16.msrb.mxu3 %v1169_v29  ;;  %v1164_v31 = vsel %vm791_vm3, %v2369_v28, 0.0 }
 0x610   : > { %1165 = vadd.xlane.f32.xlu2 %v1164_v31 }
 0x612   : > { %2095 = vmatmul.msk.bf16.vlgmr.msrb.gmra.mxu3 %vm791_vm3, %v1167_v30 }
 0x613   : > { %1288 = vmatpush.bf16.msra.mxu3 %v3156_v21 }
 0x61b   : > { %v1079_v32 = vpop.permute.xlu1 %1078 }
 0x61c   : > { %1091 = vmatpush.bf16.msra.mxu2 %v1079_v32 }
 0x623   : > { %v1194_v36 = vpop.permute.xlu1 %1193 }
 0x628   : > { %1384 = vrot.lane.b32.xlu2 %v3167_v42, %s2801_s28 }
 0x62b   : > { %v1298_v21 = vpop.permute.xlu1 %1297 }
 0x62c   : > { %v1303_v43 = vsel %vm770_vm2, %v1298_v21, 0 }
 0x633   : > { %v1383_v58 = vpop.permute.xlu1 %1382 }
 0x639   : > { %v1064_v33 = vpop.xlane.xlu0 %1063 }
 0x63a   : > { %v1066_v34 = vsub.f32 %v1056_v3, %v1064_v33 }
 0x63c   : > { %v1069_v35 = vmul.f32 1.442695, %v1066_v34 }
 0x63e   : > { %2370 = vpow2.f32 %v1069_v35 }
 0x644   : > { %v2371_v37 = vpop.eup %2370 }
 0x645   : > { %v1077_v38 = vpack.c.bf16 %v2371_v37, %v2365_v23  ;;  %v1074_v39 = vsel %vm791_vm3, %v2371_v37, 0.0 }
 0x646   : > { %1075 = vadd.xlane.f32.xlu0 %v1074_v39 }
 0x647   : > { %2092 = vmatmul.msk.bf16.vlgmr.msra.gmra.mxu2 %vm791_vm3, %v1077_v38 }
 0x64c   : > { %v1196_v40 = vpop.permute.xlu0 %1195 }
 0x64d   : > { %v1201_v41 = vsel %vm770_vm2, %v1196_v40, 0 }
 0x64e   : > { %1210 = vmatpush.bf16.xpose.msrb.mxu2 %v1201_v41 }
 0x654   : > { %v1296_v44 = vpop.permute.xlu0 %1295 }
 0x656   : > { %1312 = vmatpush.bf16.xpose.msra.mxu2 %v1303_v43 }
 0x657   : > { %2096 = vmatmul.msk.bf16.vlgmr.msrb.gmra.mxu2 %vm770_vm2, %v1194_v36 }
 0x65a   : > { %1236 = vrot.lane.b32.xlu0 %v3167_v42, %s2796_s6  ;;  %s690_s6 = scalar_lea.vmem %s3459_s15, %s3456_s27 }
 0x662   : > { %1338 = vrot.lane.b32.xlu0 %v3167_v42, %s2799_s4 }
 0x667   : > { %2100 = vmatmul.msk.bf16.vlgmr.msra.gmra.mxu2 %vm770_vm2, %v1296_v44 }
 0x67a   : > { %v1073_v60 = vpop.xlane.xlu1 %1072 }
 0x67b   : > { %v1163_v46 = vpop.xlane.xlu2 %1162 }
 0x67c   : > { %2372 = vrcp.f32 %v1163_v46 }
 0x682   : > { %v2373_v50 = vpop.eup %2372 }
 0x683   : > { %v1166_v47 = vpop.xlane.xlu2 %1165 }
 0x684   : > { %2374 = vrcp.f32 %v1166_v47 }
 0x685   : > { %2376 = vrcp.f32 %v1073_v60 }
 0x68a   : > { %v2375_v51 = vpop.eup %2374 }
 0x68b   : > { %v1385_v48 = vpop.permute.xlu2 %1384  ;;  %v2377_v2 = vpop.eup %2376 }
 0x68c   : > { %v1390_v49 = vsel %vm770_vm2, %v1385_v48, 0 }
 0x68d   : > { %1399 = vmatpush.bf16.xpose.msrb.mxu3 %v1390_v49 }
 0x695   : > { %v1183_v10 = vpop.f32.mrf.mxu3 }
 0x696   : > { %v1190_v53 = vmul.f32 %v2373_v50, %v1183_v10 }
 0x69d   : > { %v1185_v52 = vpop.f32.mrf.mxu3 }
 0x69e   : > { %v1191_v54 = vmul.f32 %v2375_v51, %v1185_v52 }
 0x6a0   : > { %v1192_v55 = vpack.c.bf16 %v1191_v54, %v1190_v53 }
 0x6a2   : > { %2099 = vmatmul.msk.bf16.vlgmr.msra.gmra.mxu3 %vm770_vm2, %v1192_v55 }
 0x6b2   : > { %2103 = vmatmul.msk.bf16.vlgmr.msrb.gmra.mxu3 %vm770_vm2, %v1383_v58 }
 0x6b9   : > { %v1076_v59 = vpop.xlane.xlu0 %1075 }
 0x6ba   : > { %2378 = vrcp.f32 %v1076_v59 }
 0x6c0   : > { %v2379_v45 = vpop.eup %2378 }
 0x6ca   : > { %v1093_v61 = vpop.f32.mrf.mxu2 }
 0x6cb   : > { %v1100_v11 = vmul.f32 %v2377_v2, %v1093_v61  ;;  %v3254_v2 = vld [vmem:[%s688_s7] ss:$0 sm:$0xff] }
 0x6cc   : > { %v1237_v1 = vpop.permute.xlu0 %1236 }
 0x6cd   : > { %1249 = vmatpush.bf16.msrb.mxu0 %v1237_v1 }
 0x6d2   : > { %v1095_v8 = vpop.f32.mrf.mxu2 }
 0x6d3   : > { %v1101_v12 = vmul.f32 %v2379_v45, %v1095_v8  ;;  %v943_v45 = vadd.f32 %v3185_v63, %v3148_v9 }
 0x6d4   : > { %v1339_v13 = vpop.permute.xlu0 %1338 }
 0x6d5   : > { %v1102_v3 = vpack.c.bf16 %v1101_v12, %v1100_v11 }
 0x6d7   : > { %2093 = vmatmul.msk.bf16.vlgmr.msra.gmra.mxu0 %vm770_vm2, %v1102_v3  ;;  %v1034_v3 = vadd.f32 %v3187_v0, %v943_v45 }
 0x6d8   : > { %1351 = vmatpush.bf16.msra.mxu0 %v1339_v13 }
 0x6da   : > { %v1212_v14 = vpop.f32.mrf.mxu2 }
 0x6db   : > { %v1217_v15 = vsel %vm791_vm3, %v1212_v14, -inf }
 0x6dc   : > { %1218 = vmax.xlane.f32.xlu2 %v1217_v15 }
 0x6e2   : > { %v1214_v16 = vpop.f32.mrf.mxu2 }
 0x6e3   : > { %v1220_v17 = vsel %vm791_vm3, %v1214_v16, -inf }
 0x6e4   : > { %1221 = vmax.xlane.f32.xlu1 %v1220_v17 }
 0x6ea   : > { %v1314_v18 = vpop.f32.mrf.mxu2 }
 0x6eb   : > { %v1319_v19 = vsel %vm791_vm3, %v1314_v18, -inf }
 0x6ec   : > { %1320 = vmax.xlane.f32.xlu2 %v1319_v19 }
 0x6f2   : > { %v1316_v27 = vpop.f32.mrf.mxu2 }
 0x6f3   : > { %v1322_v28 = vsel %vm791_vm3, %v1316_v27, -inf }
 0x725   : > { %v3234_v20 = vpop.f32.mrf.mxu3 }
 0x72d   : > { %v3236_v22 = vpop.f32.mrf.mxu3 }
 0x735   : > { %v1401_v23 = vpop.f32.mrf.mxu3 }
 0x736   : > { %v1406_v24 = vsel %vm791_vm3, %v1401_v23, -inf }
 0x737   : > { %1407 = vmax.xlane.f32.xlu2 %v1406_v24 }
 0x73d   : > { %v1403_v25 = vpop.f32.mrf.mxu3 }
 0x73e   : > { %v1409_v26 = vsel %vm791_vm3, %v1403_v25, -inf }
 0x73f   : > { %1410 = vmax.xlane.f32.xlu1 %v1409_v26 }
 0x747   : > { %1323 = vmax.xlane.f32.xlu1 %v1322_v28 }
 0x74f   : > { %v1219_v29 = vpop.xlane.xlu2 %1218  ;;  %1425 = vrot.lane.b32.xlu2 %v3167_v42, %s2803_s18  ;;  %s3461_s18 = sld [smem:[#allocation31_spill]] }
 0x750   : > { %v1223_v30 = vsub.f32 %v1212_v14, %v1219_v29 }
 0x752   : > { %v1225_v31 = vmul.f32 1.442695, %v1223_v30 }
 0x754   : > { %2380 = vpow2.f32 %v1225_v31  ;;  %v1118_v59 = vpop.f32.mrf.mxu0 }
 0x755   : > { %v1123_v1 = vadd.f32 %v1118_v59, %v3183_v62  ;;  %s704_s7 = scalar_lea.vmem %s3461_s18, %s2154_s29 }
 0x757   : > { %v1222_v32 = vpop.xlane.xlu1 %1221  ;;  %v1472_v8 = vadd.f32 %v3254_v2, %v1123_v1 }
 0x758   : > { %v1224_v33 = vsub.f32 %v1214_v16, %v1222_v32 }
 0x759   : > { %v3262_v14 = vadd.f32 %v1472_v8, %v3083_v6 }
 0x75a   : > { %v2381_v34 = vpop.eup %2380  ;;  %v1227_v35 = vmul.f32 1.442695, %v1224_v33 }
 0x75b   : > { %v1229_v36 = vsel %vm791_vm3, %v2381_v34, 0.0  ;;  %v1480_v15 = vsel %vm740_vm1, %v3262_v14, 0.0 }
 0x75c   : > { %2382 = vpow2.f32 %v1227_v35  ;;  %1230 = vadd.xlane.f32.xlu1 %v1229_v36  ;;  %v1120_v12 = vpop.f32.mrf.mxu0 }
 0x75d   : > { %v1124_v13 = vadd.f32 %v1120_v12, %v1034_v3 }
 0x75f   : > { %v1321_v37 = vpop.xlane.xlu2 %1320  ;;  %v1473_v62 = vadd.f32 %v3254_v2, %v1124_v13 }
 0x760   : > { %v1325_v38 = vsub.f32 %v1314_v18, %v1321_v37 }
 0x761   : > { %v3268_v9 = vadd.f32 %v1473_v62, %v3085_v7 }
 0x762   : > { %v2383_v39 = vpop.eup %2382  ;;  %v1327_v21 = vmul.f32 1.442695, %v1325_v38 }
 0x763   : > { %v1235_v40 = vpack.c.bf16 %v2383_v39, %v2381_v34  ;;  %v1232_v41 = vsel %vm791_vm3, %v2383_v39, 0.0  ;;  %v1483_v63 = vsel %vm740_vm1, %v3268_v9, 0.0 }
 0x764   : > { %2384 = vpow2.f32 %v1327_v21  ;;  %1233 = vadd.xlane.f32.xlu0 %v1232_v41 }
 0x765   : > { %2097 = vmatmul.msk.bf16.vlgmr.msrb.gmra.mxu0 %vm791_vm3, %v1235_v40 }
 0x766   : > { %1460 = vmatpush.bf16.msrb.mxu0 %v1107_v57 }
 0x76a   : > { %v2385_v42 = vpop.eup %2384 }
 0x76b   : > { %v1331_v43 = vsel %vm791_vm3, %v2385_v42, 0.0 }
 0x76c   : > { %1332 = vadd.xlane.f32.xlu1 %v1331_v43 }
 0x7aa   : > { %v1408_v44 = vpop.xlane.xlu2 %1407 }
 0x7ab   : > { %v1412_v46 = vsub.f32 %v1401_v23, %v1408_v44 }
 0x7ad   : > { %v1414_v47 = vmul.f32 1.442695, %v1412_v46 }
 0x7af   : > { %2386 = vpow2.f32 %v1414_v47 }
 0x7b2   : > { %v1411_v48 = vpop.xlane.xlu1 %1410  ;;  %v1426_v49 = vpop.permute.xlu2 %1425 }
 0x7b3   : > { %v1413_v10 = vsub.f32 %v1403_v25, %v1411_v48  ;;  %1438 = vmatpush.bf16.msrb.mxu2 %v1426_v49 }
 0x7b5   : > { %v2387_v50 = vpop.eup %2386  ;;  %v1416_v51 = vmul.f32 1.442695, %v1413_v10 }
 0x7b6   : > { %v1418_v52 = vsel %vm791_vm3, %v2387_v50, 0.0 }
 0x7b7   : > { %2388 = vpow2.f32 %v1416_v51  ;;  %1419 = vadd.xlane.f32.xlu2 %v1418_v52 }
 0x7ba   : > { %v1324_v53 = vpop.xlane.xlu1 %1323 }
 0x7bb   : > { %v1326_v54 = vsub.f32 %v1316_v27, %v1324_v53 }
 0x7bd   : > { %v2389_v55 = vpop.eup %2388  ;;  %v1329_v56 = vmul.f32 1.442695, %v1326_v54 }
 0x7be   : > { %v1424_v57 = vpack.c.bf16 %v2389_v55, %v2387_v50  ;;  %v1421_v11 = vsel %vm791_vm3, %v2389_v55, 0.0 }
 0x7bf   : > { %2390 = vpow2.f32 %v1329_v56 }
 0x7c0   : > { %2104 = vmatmul.msk.bf16.vlgmr.msrb.gmra.mxu2 %vm791_vm3, %v1424_v57 }
 0x7c5   : > { %v2391_v58 = vpop.eup %2390 }
 0x7c6   : > { %v1337_v60 = vpack.c.bf16 %v2391_v58, %v2385_v42  ;;  %v1334_v61 = vsel %vm791_vm3, %v2391_v58, 0.0  ;;  %v2804_v42 = vmov 32.0  }
 0x7c7   : > { %1335 = vadd.xlane.f32.xlu1 %v1334_v61 }
 0x7c8   : > { %2101 = vmatmul.msk.bf16.vlgmr.msra.gmra.mxu0 %vm791_vm3, %v1337_v60  ;;  %vm1664_vm3 = vcmask 523264  }
 0x7cf   : > { %1422 = vadd.xlane.f32.xlu1 %v1421_v11  ;;  %v1231_v16 = vpop.xlane.xlu1 %1230 }
 0x7d0   : > { %2392 = vrcp.f32 %v1231_v16 }
 0x7d6   : > { %v2393_v6 = vpop.eup %2392 }
 0x7d7   : > { %1481 = vadd.xlane.f32.xlu1 %v1480_v15  ;;  %v1234_v17 = vpop.xlane.xlu0 %1233 }
 0x7d8   : > { %2394 = vrcp.f32 %v1234_v17 }
 0x7de   : > { %v2395_v18 = vpop.eup %2394 }
 0x7df   : > { %1484 = vadd.xlane.f32.xlu1 %v1483_v63  ;;  %v1333_v26 = vpop.xlane.xlu1 %1332 }
 0x7e2   : > { %v1251_v0 = vpop.f32.mrf.mxu0 }
 0x7e3   : > { %v1258_v23 = vmul.f32 %v2393_v6, %v1251_v0 }
 0x7ea   : > { %v1253_v19 = vpop.f32.mrf.mxu0 }
 0x7eb   : > { %v1259_v24 = vmul.f32 %v2395_v18, %v1253_v19 }
 0x7ed   : > { %v1260_v25 = vpack.c.bf16 %v1259_v24, %v1258_v23 }
 0x7ef   : > { %2098 = vmatmul.msk.bf16.vlgmr.msrb.gmra.mxu1 %vm770_vm2, %v1260_v25 }
 0x82a   : > { %v1420_v27 = vpop.xlane.xlu2 %1419 }
 0x82b   : > { %2396 = vrcp.f32 %v1420_v27 }
 0x831   : > { %v2397_v31 = vpop.eup %2396 }
 0x83a   : > { %v1336_v7 = vpop.xlane.xlu1 %1335 }
 0x842   : > { %v1423_v28 = vpop.xlane.xlu1 %1422 }
 0x843   : > { %v1440_v29 = vpop.f32.mrf.mxu2  ;;  %2398 = vrcp.f32 %v1423_v28 }
 0x844   : > { %2400 = vrcp.f32 %v1333_v26  ;;  %v1447_v35 = vmul.f32 %v2397_v31, %v1440_v29 }
 0x845   : > { %v1353_v30 = vpop.f32.mrf.mxu0  ;;  %2402 = vrcp.f32 %v1336_v7  ;;  %v2152_v7 = vld [vmem:[%s695_s10] sm:$0xff] }
 0x846   : > { %2404 = vrcp.f32 %v2804_v42 }
 0x849   : > { %v2399_v32 = vpop.eup %2398 }
 0x84a   : > { %v2401_v34 = vpop.eup %2400  ;;  %v1482_v50 = vpop.xlane.xlu1 %1481 }
 0x84b   : > { %v1442_v33 = vpop.f32.mrf.mxu2  ;;  %v2403_v37 = vpop.eup %2402  ;;  %v1360_v39 = vmul.f32 %v2401_v34, %v1353_v30 }
 0x84c   : > { %v1448_v36 = vmul.f32 %v2399_v32, %v1442_v33  ;;  %v2405_v44 = vpop.eup %2404 }
 0x84d   : > { %v1355_v38 = vpop.f32.mrf.mxu0  ;;  %v1493_v46 = vmul.f32 32.0, %v2405_v44  ;;  %vm1497_vm5 = vweird.f32 %v2405_v44 }
 0x84e   : > { %v1449_v21 = vpack.c.bf16 %v1448_v36, %v1447_v35  ;;  %v1361_v40 = vmul.f32 %v2403_v37, %v1355_v38 }
 0x84f   : > { %v1494_v47 = vsub.f32 1.0, %v1493_v46 }
 0x850   : > { %v1362_v41 = vpack.c.bf16 %v1361_v40, %v1360_v39  ;;  %2105 = vmatmul.msk.bf16.vlgmr.msrb.gmra.mxu0 %vm770_vm2, %v1449_v21 }
 0x851   : > { %v1495_v49 = vmul.f32 %v2405_v44, %v1494_v47 }
 0x852   : > { %2102 = vmatmul.msk.bf16.vlgmr.msra.gmra.mxu1 %vm770_vm2, %v1362_v41  ;;  %v1485_v8 = vpop.xlane.xlu1 %1484 }
 0x853   : > { %v1496_v10 = vadd.f32 %v2405_v44, %v1495_v49 }
 0x855   : > { %v3276_v55 = vsel %vm1497_vm5, %v2405_v44, %v1496_v10 }
 0x856   : > { %v1499_v57 = vmul.f32 %v3276_v55, %v1482_v50  ;;  %v1500_v3 = vmul.f32 %v3276_v55, %v1485_v8  ;;  %v2158_v8 = vld [vmem:[%s704_s7 + $0x18] sm:$0xff] }
 0x857   : > { %1675 = vmatpush.bf16.msra.mxu3 %v2158_v8 }
 0x858   : > { %v1503_v61 = vsub.f32 %v3262_v14, %v1499_v57 }
 0x85a   : > { %v1507_v13 = vmul.f32 %v1503_v61, %v1503_v61 }
 0x85c   : > { %v1511_v15 = vsel %vm740_vm1, %v1507_v13, 0.0 }
 0x86c   : > { %v1273_v43 = vpop.f32.mrf.mxu1 }
 0x86d   : > { %v1291_v51 = vadd.f32 %v3234_v20, %v1273_v43  ;;  %v2334_v43 = vld [vmem:[%s690_s6] ss:$0 sm:$0xff]  ;;  %s717_s6 = scalar_lea.vmem [#allocation14], %s3456_s27 }
 0x874   : > { %v1275_v48 = vpop.f32.mrf.mxu1 }
 0x875   : > { %v1293_v59 = vadd.f32 %v3236_v22, %v1275_v48  ;;  %v2335_v48 = vld [vmem:[%s692_s5] ss:$0 sm:$0xff] }
 0x8cd   : > { %v1462_v52 = vpop.f32.mrf.mxu0 }
 0x8cf   : > { %v1375_v53 = vpop.f32.mrf.mxu1 }
 0x8d0   : > { %v1380_v54 = vadd.f32 %v1375_v53, %v1291_v51 }
 0x8d2   : > { %v1467_v56 = vadd.f32 %v1462_v52, %v1380_v54 }
 0x8d4   : > { %v1474_v58 = vadd.f32 %v3254_v2, %v1467_v56 }
 0x8d5   : > { %v1464_v11 = vpop.f32.mrf.mxu0 }
 0x8d6   : > { %v1478_v60 = vadd.f32 %v1474_v58, %v3141_v4  ;;  %v1504_v4 = vsub.f32 %v3268_v9, %v1500_v3  ;;  %v2153_v9 = vld [vmem:[%s695_s10 + $0x8] sm:$0xff] }
 0x8d7   : > { %v1377_v20 = vpop.f32.mrf.mxu1  ;;  %1618 = vmatpush.bf16.msrb.mxu1 %v2153_v9 }
 0x8d8   : > { %v1381_v1 = vadd.f32 %v1377_v20, %v1293_v59  ;;  %v1486_v45 = vsel %vm740_vm1, %v1478_v60, 0.0  ;;  %v1508_v63 = vmul.f32 %v1504_v4, %v1504_v4 }
 0x8d9   : > { %1487 = vadd.xlane.f32.xlu0 %v1486_v45 }
 0x8da   : > { %v1468_v12 = vadd.f32 %v1464_v11, %v1381_v1  ;;  %v1514_v16 = vsel %vm740_vm1, %v1508_v63, 0.0 }
 0x8db   : > { %1619 = vmatpush.bf16.msrb.mxu1 %v2152_v7  ;;  %v2336_v7 = vld [vmem:[%s700_s26] ss:$0 sm:$0xff] }
 0x8dc   : > { %v1475_v62 = vadd.f32 %v3254_v2, %v1468_v12 }
 0x8de   : > { %v1479_v22 = vadd.f32 %v1475_v62, %v3143_v5  ;;  %v2157_v62 = vld [vmem:[%s704_s7 + $0x10] sm:$0xff] }
 0x8df   : > { %1676 = vmatpush.bf16.msra.mxu3 %v2157_v62 }
 0x8e0   : > { %v1489_v14 = vsel %vm740_vm1, %v1479_v22, 0.0 }
 0x8e1   : > { %1512 = vadd.xlane.f32.xlu0 %v1511_v15  ;;  %1490 = vadd.xlane.f32.xlu1 %v1489_v14  ;;  %v2156_v14 = vld [vmem:[%s704_s7 + $0x8] sm:$0xff] }
 0x8e3   : > { %1677 = vmatpush.bf16.msra.mxu3 %v2156_v14 }
 0x8e9   : > { %1515 = vadd.xlane.f32.xlu1 %v1514_v16 }
 0x94c   : > { %v1488_v17 = vpop.xlane.xlu0 %1487 }
 0x94d   : > { %v1501_v0 = vmul.f32 %v3276_v55, %v1488_v17 }
 0x94f   : > { %v3297_v6 = vsub.f32 %v1478_v60, %v1501_v0  ;;  %v2155_v0 = vld [vmem:[%s704_s7] sm:$0xff] }
 0x950   : > { %1678 = vmatpush.bf16.msra.mxu3 %v2155_v0 }
 0x951   : > { %v1509_v5 = vmul.f32 %v3297_v6, %v3297_v6 }
 0x953   : > { %v1517_v2 = vsel %vm740_vm1, %v1509_v5, 0.0 }
 0x954   : > { %1518 = vadd.xlane.f32.xlu2 %v1517_v2  ;;  %v1513_v18 = vpop.xlane.xlu0 %1512  ;;  %v1491_v19 = vpop.xlane.xlu1 %1490 }
 0x955   : > { %v1523_v23 = vmul.f32 %v1513_v18, %v3276_v55  ;;  %v1502_v24 = vmul.f32 %v3276_v55, %v1491_v19 }
 0x957   : > { %v1527_v25 = vadd.f32 1e-05, %v1523_v23  ;;  %v3308_v26 = vsub.f32 %v1479_v22, %v1502_v24 }
 0x959   : > { %2406 = vrsqrt.f32 %v1527_v25  ;;  %v1510_v27 = vmul.f32 %v3308_v26, %v3308_v26  ;;  %vm1537_vm7 = vweird.f32 %v1527_v25 }
 0x95b   : > { %v1520_v28 = vsel %vm740_vm1, %v1510_v27, 0.0 }
 0x95c   : > { %1521 = vadd.xlane.f32.xlu0 %v1520_v28  ;;  %v1516_v29 = vpop.xlane.xlu1 %1515 }
 0x95d   : > { %v1524_v30 = vmul.f32 %v1516_v29, %v3276_v55 }
 0x95f   : > { %v2407_v31 = vpop.eup %2406  ;;  %v1528_v32 = vadd.f32 1e-05, %v1524_v30 }
 0x960   : > { %v1532_v33 = vmul.f32 %v2407_v31, %v1527_v25  ;;  %vm1538_vm6 = vweird.f32 %v2407_v31 }
 0x961   : > { %2408 = vrsqrt.f32 %v1528_v32  ;;  %vm1539_vm8 = vmor %vm1537_vm7, %vm1538_vm6  ;;  %vm1547_vm10 = vweird.f32 %v1528_v32 }
 0x962   : > { %v1533_v34 = vmul.f32 %v2407_v31, %v1532_v33 }
 0x964   : > { %v1534_v35 = vmul.f32 0.5, %v1533_v34 }
 0x966   : > { %v1535_v36 = vsub.f32 1.5, %v1534_v35 }
 0x967   : > { %v2409_v37 = vpop.eup %2408 }
 0x968   : > { %v1536_v38 = vmul.f32 %v2407_v31, %v1535_v36  ;;  %v1542_v39 = vmul.f32 %v2409_v37, %v1528_v32  ;;  %vm1548_vm9 = vweird.f32 %v2409_v37 }
 0x969   : > { %vm1549_vm11 = vmor %vm1547_vm10, %vm1548_vm9 }
 0x96a   : > { %v1543_v21 = vmul.f32 %v2409_v37, %v1542_v39  ;;  %v1540_v40 = vsel %vm1539_vm8, %v2407_v31, %v1536_v38  ;;  %v2337_v38 = vld [vmem:[%s713_s21] ss:$0 sm:$0xff] }
 0x96b   : > { %v1571_v44 = vmul.f32 %v1540_v40, %v1503_v61 }
 0x96c   : > { %v1544_v41 = vmul.f32 0.5, %v1543_v21 }
 0x96d   : > { %v1578_v49 = vmul.f32 %v2334_v43, %v1571_v44 }
 0x96e   : > { %v1545_v42 = vsub.f32 1.5, %v1544_v41 }
 0x96f   : > { %v3322_v51 = vadd.f32 %v2335_v48, %v1578_v49 }
 0x970   : > { %v1546_v46 = vmul.f32 %v2409_v37, %v1545_v42 }
 0x972   : > { %v1550_v47 = vsel %vm1549_vm11, %v2409_v37, %v1546_v46 }
 0x973   : > { %v1572_v10 = vmul.f32 %v1550_v47, %v1504_v4 }
 0x975   : > { %v1579_v50 = vmul.f32 %v2334_v43, %v1572_v10 }
 0x977   : > { %v3324_v52 = vadd.f32 %v2335_v48, %v1579_v50 }
 0x979   : > { %v1589_v53 = vpack.c.bf16 %v3324_v52, %v3322_v51 }
 0x97b   : > { %2114 = vmatmul.msk.bf16.vlgmr.msrb.gmra.mxu1 %vm740_vm1, %v1589_v53 }
 0x9c7   : > { %v1519_v54 = vpop.xlane.xlu2 %1518 }
 0x9c8   : > { %v1525_v56 = vmul.f32 %v1519_v54, %v3276_v55 }
 0x9ca   : > { %v1529_v57 = vadd.f32 1e-05, %v1525_v56 }
 0x9cc   : > { %2410 = vrsqrt.f32 %v1529_v57  ;;  %vm1557_vm13 = vweird.f32 %v1529_v57 }
 0x9cf   : > { %v1522_v58 = vpop.xlane.xlu0 %1521 }
 0x9d0   : > { %v1526_v59 = vmul.f32 %v1522_v58, %v3276_v55 }
 0x9d2   : > { %v2411_v60 = vpop.eup %2410  ;;  %v1530_v20 = vadd.f32 1e-05, %v1526_v59 }
 0x9d3   : > { %v1552_v61 = vmul.f32 %v2411_v60, %v1529_v57  ;;  %vm1558_vm12 = vweird.f32 %v2411_v60 }
 0x9d4   : > { %2412 = vrsqrt.f32 %v1530_v20  ;;  %vm1559_vm14 = vmor %vm1557_vm13, %vm1558_vm12  ;;  %vm1567_vm0 = vweird.f32 %v1530_v20 }
 0x9d5   : > { %v1553_v1 = vmul.f32 %v2411_v60, %v1552_v61 }
 0x9d7   : > { %v1554_v45 = vmul.f32 0.5, %v1553_v1 }
 0x9d9   : > { %v1555_v11 = vsub.f32 1.5, %v1554_v45 }
 0x9da   : > { %v2413_v12 = vpop.eup %2412 }
 0x9db   : > { %v1556_v3 = vmul.f32 %v2411_v60, %v1555_v11  ;;  %v1562_v13 = vmul.f32 %v2413_v12, %v1530_v20  ;;  %vm1568_vm15 = vweird.f32 %v2413_v12 }
 0x9dc   : > { %vm1569_vm2 = vmor %vm1567_vm0, %vm1568_vm15 }
 0x9dd   : > { %v1563_v22 = vmul.f32 %v2413_v12, %v1562_v13  ;;  %v1560_v4 = vsel %vm1559_vm14, %v2411_v60, %v1556_v3 }
 0x9de   : > { %v1573_v16 = vmul.f32 %v1560_v4, %v3297_v6 }
 0x9df   : > { %v1564_v15 = vmul.f32 0.5, %v1563_v22 }
 0x9e0   : > { %v1580_v9 = vmul.f32 %v2334_v43, %v1573_v16 }
 0x9e1   : > { %v1565_v63 = vsub.f32 1.5, %v1564_v15 }
 0x9e2   : > { %v1587_v19 = vadd.f32 %v2335_v48, %v1580_v9 }
 0x9e3   : > { %v1566_v17 = vmul.f32 %v2413_v12, %v1565_v63 }
 0x9e5   : > { %v1570_v5 = vsel %vm1569_vm2, %v2413_v12, %v1566_v17 }
 0x9e6   : > { %v1574_v2 = vmul.f32 %v1570_v5, %v3308_v26 }
 0x9e8   : > { %v1581_v18 = vmul.f32 %v2334_v43, %v1574_v2 }
 0x9ea   : > { %v1588_v23 = vadd.f32 %v2335_v48, %v1581_v18 }
 0x9ec   : > { %v1590_v24 = vpack.c.bf16 %v1588_v23, %v1587_v19 }
 0x9ee   : > { %2115 = vmatmul.msk.bf16.gmra.mxu1 %vm740_vm1, %v1590_v24 }
 0x9f8   : > { %v1621_v25 = vpop.f32.mrf.mxu1 }
 0x9f9   : > { %v1622_v6 = vadd.f32 %v2336_v7, %v1621_v25 }
 0x9fb   : > { %v1631_v29 = vmax.f32 %v1622_v6, 0.0 }
 0xa00   : > { %v1623_v27 = vpop.f32.mrf.mxu1 }
 0xa01   : > { %v1624_v28 = vadd.f32 %v2336_v7, %v1623_v27  ;;  %v2338_v27 = vld [vmem:[%s715_s1] ss:$0 sm:$0xff] }
 0xa03   : > { %v1632_v30 = vmax.f32 %v1624_v28, 0.0 }
 0xa05   : > { %v1635_v31 = vpack.c.bf16 %v1632_v30, %v1631_v29  ;;  %v2339_v30 = vld [vmem:[%s717_s6] ss:$0 sm:$0xff] }
 0xa07   : > { %2132 = vmatmul.msk.bf16.vlgmr.msra.gmra.mxu3 %vm1664_vm3, %v1635_v31 }
 0xa6b   : > { %v1626_v26 = vpop.f32.mrf.mxu1 }
 0xa6c   : > { %v1627_v32 = vadd.f32 %v2336_v7, %v1626_v26 }
 0xa6e   : > { %v1633_v35 = vmax.f32 %v1627_v32, 0.0 }
 0xa73   : > { %v1628_v33 = vpop.f32.mrf.mxu1 }
 0xa74   : > { %v1629_v34 = vadd.f32 %v2336_v7, %v1628_v33 }
 0xa76   : > { %v1634_v36 = vmax.f32 %v1629_v34, 0.0 }
 0xa78   : > { %v1636_v37 = vpack.c.bf16 %v1634_v36, %v1633_v35 }
 0xa7a   : > { %2133 = vmatmul.msk.bf16.gmra.mxu3 %vm1664_vm3, %v1636_v37 }
 0xa8a   : > { %v1680_v39 = vpop.f32.mrf.mxu3 }
 0xa8b   : > { %v1681_v21 = vadd.f32 %v2337_v38, %v1680_v39 }
 0xa8d   : > { %v1690_v40 = vadd.f32 %v1681_v21, %v3322_v51 }
 0xa8f   : > { %v1694_v41 = vsel %vm740_vm1, %v1690_v40, 0.0 }
 0xa90   : > { %1695 = vadd.xlane.f32.xlu1 %v1694_v41 }
 0xa92   : > { %v1682_v42 = vpop.f32.mrf.mxu3 }
 0xa93   : > { %v1683_v43 = vadd.f32 %v2337_v38, %v1682_v42 }
 0xa95   : > { %v1691_v44 = vadd.f32 %v1683_v43, %v3324_v52 }
 0xa97   : > { %v1697_v46 = vsel %vm740_vm1, %v1691_v44, 0.0 }
 0xa98   : > { %1698 = vadd.xlane.f32.xlu2 %v1697_v46 }
 0xafd   : > { %v1685_v47 = vpop.f32.mrf.mxu3 }
 0xafe   : > { %v1686_v48 = vadd.f32 %v2337_v38, %v1685_v47 }
 0xb00   : > { %v1692_v49 = vadd.f32 %v1686_v48, %v1587_v19 }
 0xb02   : > { %v1700_v10 = vsel %vm740_vm1, %v1692_v49, 0.0 }
 0xb03   : > { %1701 = vadd.xlane.f32.xlu0 %v1700_v10  ;;  %v1696_v50 = vpop.xlane.xlu1 %1695 }
 0xb04   : > { %v1706_v51 = vmul.f32 %v1696_v50, %v3276_v55 }
 0xb05   : > { %v1687_v53 = vpop.f32.mrf.mxu3 }
 0xb06   : > { %v1710_v54 = vsub.f32 %v1690_v40, %v1706_v51  ;;  %v1688_v56 = vadd.f32 %v2337_v38, %v1687_v53 }
 0xb08   : > { %v1693_v57 = vadd.f32 %v1688_v56, %v1588_v23  ;;  %v1714_v58 = vmul.f32 %v1710_v54, %v1710_v54 }
 0xb0a   : > { %v1703_v52 = vsel %vm740_vm1, %v1693_v57, 0.0  ;;  %v1718_v59 = vsel %vm740_vm1, %v1714_v58, 0.0 }
 0xb0b   : > { %v1699_v60 = vpop.xlane.xlu2 %1698  ;;  %1704 = vadd.xlane.f32.xlu1 %v1703_v52  ;;  %1719 = vadd.xlane.f32.xlu2 %v1718_v59 }
 0xb0c   : > { %v1707_v20 = vmul.f32 %v1699_v60, %v3276_v55 }
 0xb0e   : > { %v1711_v61 = vsub.f32 %v1691_v44, %v1707_v20 }
 0xb10   : > { %v1715_v1 = vmul.f32 %v1711_v61, %v1711_v61 }
 0xb12   : > { %v1721_v45 = vsel %vm740_vm1, %v1715_v1, 0.0 }
 0xb13   : > { %1722 = vadd.xlane.f32.xlu0 %v1721_v45 }
 0xb76   : > { %v1702_v8 = vpop.xlane.xlu0 %1701 }
 0xb77   : > { %v1708_v11 = vmul.f32 %v1702_v8, %v3276_v55 }
 0xb79   : > { %v3354_v12 = vsub.f32 %v1692_v49, %v1708_v11 }
 0xb7b   : > { %v1716_v3 = vmul.f32 %v3354_v12, %v3354_v12 }
 0xb7d   : > { %v1724_v13 = vsel %vm740_vm1, %v1716_v3, 0.0 }
 0xb7e   : > { %1725 = vadd.xlane.f32.xlu1 %v1724_v13  ;;  %v1720_v62 = vpop.xlane.xlu2 %1719  ;;  %v1705_v22 = vpop.xlane.xlu1 %1704 }
 0xb7f   : > { %v1730_v4 = vmul.f32 %v1720_v62, %v3276_v55  ;;  %v1709_v15 = vmul.f32 %v1705_v22, %v3276_v55 }
 0xb81   : > { %v1734_v14 = vadd.f32 1e-05, %v1730_v4  ;;  %v3361_v63 = vsub.f32 %v1693_v57, %v1709_v15 }
 0xb83   : > { %2414 = vrsqrt.f32 %v1734_v14  ;;  %v1717_v16 = vmul.f32 %v3361_v63, %v3361_v63  ;;  %vm1744_vm5 = vweird.f32 %v1734_v14 }
 0xb85   : > { %v1727_v17 = vsel %vm740_vm1, %v1717_v16, 0.0 }
 0xb86   : > { %v1723_v0 = vpop.xlane.xlu0 %1722  ;;  %1728 = vadd.xlane.f32.xlu2 %v1727_v17 }
 0xb87   : > { %v1731_v5 = vmul.f32 %v1723_v0, %v3276_v55 }
 0xb89   : > { %v2415_v2 = vpop.eup %2414  ;;  %v1735_v9 = vadd.f32 1e-05, %v1731_v5 }
 0xb8a   : > { %v1739_v18 = vmul.f32 %v2415_v2, %v1734_v14  ;;  %vm1745_vm4 = vweird.f32 %v2415_v2 }
 0xb8b   : > { %2416 = vrsqrt.f32 %v1735_v9  ;;  %vm1746_vm6 = vmor %vm1744_vm5, %vm1745_vm4  ;;  %vm1754_vm8 = vweird.f32 %v1735_v9 }
 0xb8c   : > { %v1740_v19 = vmul.f32 %v2415_v2, %v1739_v18 }
 0xb8e   : > { %v1741_v23 = vmul.f32 0.5, %v1740_v19 }
 0xb90   : > { %v1742_v24 = vsub.f32 1.5, %v1741_v23 }
 0xb91   : > { %v2417_v25 = vpop.eup %2416 }
 0xb92   : > { %v1743_v7 = vmul.f32 %v2415_v2, %v1742_v24  ;;  %v1749_v6 = vmul.f32 %v2417_v25, %v1735_v9  ;;  %vm1755_vm7 = vweird.f32 %v2417_v25 }
 0xb93   : > { %vm1756_vm9 = vmor %vm1754_vm8, %vm1755_vm7 }
 0xb94   : > { %v1747_v28 = vsel %vm1746_vm6, %v2415_v2, %v1743_v7  ;;  %v1750_v29 = vmul.f32 %v2417_v25, %v1749_v6 }
 0xb95   : > { %v1778_v31 = vmul.f32 %v1747_v28, %v1710_v54 }
 0xb96   : > { %v1751_v26 = vmul.f32 0.5, %v1750_v29 }
 0xb97   : > { %v1785_v32 = vmul.f32 %v2338_v27, %v1778_v31 }
 0xb98   : > { %v1752_v33 = vsub.f32 1.5, %v1751_v26 }
 0xb99   : > { %v1792_v34 = vadd.f32 %v2339_v30, %v1785_v32 }
 0xb9a   : > { %v1753_v35 = vmul.f32 %v2417_v25, %v1752_v33 }
 0xb9b   : > { %1796 = vst.msk [vmem:[#allocation2] sm:$0xff] %vm740_vm1, %v1792_v34 }
 0xb9c   : > { %v1757_v36 = vsel %vm1756_vm9, %v2417_v25, %v1753_v35 }
 0xb9d   : > { %v1779_v37 = vmul.f32 %v1757_v36, %v1711_v61 }
 0xb9f   : > { %v1786_v38 = vmul.f32 %v2338_v27, %v1779_v37 }
 0xba1   : > { %v1793_v39 = vadd.f32 %v2339_v30, %v1786_v38 }
 0xba3   : > { %1797 = vst.msk [vmem:[#allocation2 + $0x8] sm:$0xff] %vm740_vm1, %v1793_v39 }
 0xbf1   : > { %v1726_v21 = vpop.xlane.xlu1 %1725 }
 0xbf2   : > { %v1732_v40 = vmul.f32 %v1726_v21, %v3276_v55 }
 0xbf4   : > { %v1736_v41 = vadd.f32 1e-05, %v1732_v40 }
 0xbf6   : > { %2418 = vrsqrt.f32 %v1736_v41  ;;  %vm1764_vm11 = vweird.f32 %v1736_v41 }
 0xbf9   : > { %v1729_v42 = vpop.xlane.xlu2 %1728 }
 0xbfa   : > { %v1733_v43 = vmul.f32 %v1729_v42, %v3276_v55 }
 0xbfc   : > { %v2419_v44 = vpop.eup %2418  ;;  %v1737_v46 = vadd.f32 1e-05, %v1733_v43 }
 0xbfd   : > { %v1759_v47 = vmul.f32 %v2419_v44, %v1736_v41  ;;  %vm1765_vm10 = vweird.f32 %v2419_v44 }
 0xbfe   : > { %2420 = vrsqrt.f32 %v1737_v46  ;;  %vm1766_vm12 = vmor %vm1764_vm11, %vm1765_vm10  ;;  %vm1774_vm14 = vweird.f32 %v1737_v46 }
 0xbff   : > { %v1760_v48 = vmul.f32 %v2419_v44, %v1759_v47 }
 0xc01   : > { %v1761_v49 = vmul.f32 0.5, %v1760_v48 }
 0xc03   : > { %v1762_v10 = vsub.f32 1.5, %v1761_v49 }
 0xc04   : > { %v2421_v50 = vpop.eup %2420 }
 0xc05   : > { %v1763_v51 = vmul.f32 %v2419_v44, %v1762_v10  ;;  %v1769_v53 = vmul.f32 %v2421_v50, %v1737_v46  ;;  %vm1775_vm13 = vweird.f32 %v2421_v50 }
 0xc06   : > { %vm1776_vm15 = vmor %vm1774_vm14, %vm1775_vm13 }
 0xc07   : > { %v1767_v54 = vsel %vm1766_vm12, %v2419_v44, %v1763_v51  ;;  %v1770_v56 = vmul.f32 %v2421_v50, %v1769_v53 }
 0xc08   : > { %v1780_v57 = vmul.f32 %v1767_v54, %v3354_v12 }
 0xc09   : > { %v1771_v58 = vmul.f32 0.5, %v1770_v56 }
 0xc0a   : > { %v1787_v52 = vmul.f32 %v2338_v27, %v1780_v57 }
 0xc0b   : > { %v1772_v55 = vsub.f32 1.5, %v1771_v58 }
 0xc0c   : > { %v1794_v59 = vadd.f32 %v2339_v30, %v1787_v52 }
 0xc0d   : > { %v1773_v60 = vmul.f32 %v2421_v50, %v1772_v55 }
 0xc0e   : > { %1798 = vst.msk [vmem:[#allocation2 + $0x10] sm:$0xff] %vm740_vm1, %v1794_v59 }
 0xc0f   : > { %v1777_v20 = vsel %vm1776_vm15, %v2421_v50, %v1773_v60 }
 0xc10   : > { %v1781_v61 = vmul.f32 %v1777_v20, %v3361_v63 }
 0xc12   : > { %v1788_v1 = vmul.f32 %v2338_v27, %v1781_v61  ;;  %1803 = sbr.rel (%p2134_p1) target bundleno = 3251 (0xcb3), region = 124 }
 0xc14   : > { %v1795_v45 = vadd.f32 %v2339_v30, %v1788_v1 }
 0xc16   : > { %1799 = vst.msk [vmem:[#allocation2 + $0x18] sm:$0xff] %vm740_vm1, %v1795_v45 }
 0xc17   : > { %v2160_v8 = vld [vmem:[#allocation16 + $0x8] sm:$0xff]  ;;  %v1804_v11 = vsel %vm740_vm1, %v1792_v34, 0.0  ;;  %v1805_v12 = vsel %vm740_vm1, %v1793_v39, 0.0  ;;  %v1821_v3 = vsel %vm740_vm1, %v1794_v59, 0.0  ;;  %v2805_v62 = vmov 16.0   ;;  %v2159_v4 = vld [vmem:[#allocation16] sm:$0xff] }
 0xc18   : > { %v1806_v13 = vadd.f32 %v1805_v12, %v1804_v11  ;;  %2423 = vrcp.f32 %v2805_v62  ;;  %v1822_v22 = vsel %vm740_vm1, %v1795_v45, 0.0  ;;  %1863 = vmatpush.bf16.msra.mxu0 %v2160_v8  ;;  %vm1831_vm2 = vcmask 1040384   ;;  %v2422_v33 = vld [vmem:[%s3462_s3] ss:$0 sm:$0xff] }
 0xc19   : > { %v1823_v15 = vadd.f32 %v1822_v22, %v1821_v3 }
 0xc1a   : > { %v1807_v14 = vrot.slane %v1806_v13, 4 }
 0xc1b   : > { %v1824_v63 = vrot.slane %v1823_v15, 4 }
 0xc1c   : > { %v1808_v16 = vadd.f32 %v1807_v14, %v1806_v13  ;;  %1864 = vmatpush.bf16.msra.mxu0 %v2159_v4 }
 0xc1d   : > { %v1825_v17 = vadd.f32 %v1824_v63, %v1823_v15 }
 0xc1e   : > { %v2424_v0 = vpop.eup %2423  ;;  %v1809_v5 = vrot.slane %v1808_v16, 2 }
 0xc1f   : > { %v1814_v2 = vmul.f32 16.0, %v2424_v0  ;;  %v1826_v9 = vrot.slane %v1825_v17, 2  ;;  %vm1818_vm0 = vweird.f32 %v2424_v0 }
 0xc20   : > { %v1810_v18 = vadd.f32 %v1809_v5, %v1808_v16 }
 0xc21   : > { %v1815_v19 = vsub.f32 1.0, %v1814_v2  ;;  %v1827_v23 = vadd.f32 %v1826_v9, %v1825_v17 }
 0xc22   : > { %v1811_v24 = vrot.slane %v1810_v18, 1 }
 0xc23   : > { %v1816_v25 = vmul.f32 %v2424_v0, %v1815_v19  ;;  %v1828_v7 = vrot.slane %v1827_v23, 1 }
 0xc24   : > { %v1812_v6 = vadd.f32 %v1811_v24, %v1810_v18 }
 0xc25   : > { %v1817_v27 = vadd.f32 %v2424_v0, %v1816_v25  ;;  %v1829_v28 = vadd.f32 %v1828_v7, %v1827_v23 }
 0xc27   : > { %v1819_v29 = vsel %vm1818_vm0, %v2424_v0, %v1817_v27 }
 0xc28   : > { %v1820_v30 = vmul.f32 %v1819_v29, %v1812_v6  ;;  %v1830_v31 = vmul.f32 %v1829_v28, %v1819_v29 }
 0xc2a   : > { %v1832_v26 = vsel %vm1831_vm2, %v1820_v30, %v1830_v31 }
 0xc2b   : > { %v1833_v32 = vpack.c.bf16 %v1832_v26, %v1832_v26 }
 0xc2d   : > { %2143 = vmatmul.msk.bf16.vlgmr.msra.gmra.mxu0 %vm740_vm1, %v1833_v32 }
 0xcaa   : > { %v1866_v34 = vpop.f32.mrf.mxu0 }
 0xcab   : > { %v1867_v35 = vadd.f32 %v2422_v33, %v1866_v34 }
 0xcad   : > { %1870 = vst [vmem:[%s3072_s2] sm:$0x3] %v1867_v35 }
 0xcb2   : > { %v1868_v36 = vpop.f32.mrf.mxu0 }
 0xcb3 PF: > { %s32_s25 = sadd.s32 1, %s2777_s25   ;;  %s3463_s18 = smov %s2753_s19 }
 0xcb4   : > { %p29_p5 = scmp.ge.s32.totalorder %s32_s25, 14   ;;  %s3464_s19 = smov %s2757_s20 }
 0xcb5   : > { %s3465_s20 = smov %s3038_s14  ;;  %s3466_s21 = smov %s2769_s23 }
 0xcb6   : > { %s3467_s22 = smov %s2773_s24  ;;  %s3468_s23 = smov %s3471_s30 }
 0xcb7   : > { %s3469_s24 = smov %s3475_s17  ;;  %31 = sbr.rel (!%p29_p5) target bundleno = 22 (0x16), region = 172 }
 0xcbc   :  { %1890 = vsyncpa [#allocation4], 1 }
 0xcbd   :  { %1892 = vsyncpa [#allocation4 + $0x1], 1 }
 0xcbe   :  { %1893 = vsyncpa [#allocation6], 1 }
 0xcbf   :  { %1894 = vsyncpa [#allocation9], 1 }
 0xcc0   :  { %1895 = vsyncpa [#allocation12], 1 }
 0xcc1   :  { %1896 = vsyncpa [#allocation15], 1 }

</bundles_post_ra>
